<compile_context>
chip_gen: v7x
topology: tpu7x:2x2x1
jax: 0.10.0
libtpu: 0.0.40
codegen_flags: <defaults>
</compile_context>

<pallas_src>
import jax
import jax.numpy as jnp
from jax.experimental import pallas as pl
from jax.experimental.pallas import tpu as pltpu


def _point_fc_kernel(x_ref,
                     w1_ref, t1_ref,
                     w2_ref, t2_ref,
                     w3_ref, b3_ref,
                     o_ref):
    """Fused point-wise MLP: (Linear->BN->ReLU) x2 -> Linear(+bias).

    BN scale is pre-folded into w1/w2.  Matmul operands are bf16 with f32
    accumulation on the MXU; elementwise (shift, ReLU, bias add) stays f32.
    The input tile arrives as f32 and is cast to bf16 in-kernel.
    """
    x = x_ref[...].astype(jnp.bfloat16)

    # Layer 1: Linear(bias=False, BN-scale folded) + shift + ReLU
    h = jnp.dot(x, w1_ref[...], preferred_element_type=jnp.float32)
    h = jnp.maximum(h + t1_ref[...], 0.0)

    # Layer 2: Linear(bias=False, BN-scale folded) + shift + ReLU
    h = jnp.dot(h.astype(jnp.bfloat16), w2_ref[...],
                preferred_element_type=jnp.float32)
    h = jnp.maximum(h + t2_ref[...], 0.0)

    # Final Linear with bias.  w3 is lane-padded to 128 for the MXU; slice
    # back to num_class lanes and store the narrow output directly.
    out = jnp.dot(h.astype(jnp.bfloat16), w3_ref[...],
                  preferred_element_type=jnp.float32)
    c_out = o_ref.shape[-1]
    o_ref[...] = (out[:, :c_out] + b3_ref[...]).astype(o_ref.dtype)


def point_fc_layers(x, prep, *, tile_n=1024):
    """Apply the make_fc_layers stack to per-point features.

    Args:
      x: (N, C_in) float32 point features (N need not be tile-aligned).
      prep: dict of prepared parameters (see `prepare_params`).
    Returns:
      (N, C_out) float32 predictions (e.g. point_cls_preds).
    """
    n, c_in = x.shape
    h1 = prep["w1"].shape[1]
    h2 = prep["w2"].shape[1]
    c_out_pad = prep["w3"].shape[1]
    c_out = prep["c_out"]

    # Multiple of 16 rows (bf16 sublane packing); aim for >= 4 grid steps so
    # both v7x TensorCores get >= 2 steps each, without over-tiling tiny N.
    quarter = pl.cdiv(pl.cdiv(n, 4), 16) * 16
    tile_n = int(max(16, min(tile_n, quarter)))
    grid = pl.cdiv(n, tile_n)   # ragged last block handled by Pallas

    full = lambda shape: pl.BlockSpec(shape, lambda i: (0, 0))

    out = pl.pallas_call(
        _point_fc_kernel,
        out_shape=jax.ShapeDtypeStruct((n, c_out), jnp.float32),
        grid_spec=pltpu.PrefetchScalarGridSpec(
            num_scalar_prefetch=0,
            grid=(grid,),
            in_specs=[
                pl.BlockSpec((tile_n, c_in), lambda i: (i, 0)),   # x tile (f32)
                full((c_in, h1)), full((1, h1)),                  # w1 (BN folded), shift1
                full((h1, h2)), full((1, h2)),                    # w2 (BN folded), shift2
                full((h2, c_out_pad)), full((1, c_out)),          # w3 (lane padded), bias3
            ],
            out_specs=pl.BlockSpec((tile_n, c_out), lambda i: (i, 0)),
        ),
        compiler_params=pltpu.CompilerParams(
            dimension_semantics=("parallel",)),
    )(x, prep["w1"], prep["t1"], prep["w2"], prep["t2"],
      prep["w3"], prep["b3"])

    return out


def init_params(key, c_in, fc_cfg, c_out, eps=1e-5):
    """Deterministic synthetic parameters matching make_fc_layers shapes.

    Linear weights are stored transposed (in, out).  BatchNorm1d (eval mode)
    is folded: scale = gamma / sqrt(var + eps); shift = beta - mean * scale.
    """
    h1, h2 = fc_cfg
    ks = jax.random.split(key, 8)

    def bn_fold(kg, kb, dim):
        gamma = 1.0 + 0.1 * jax.random.normal(kg, (1, dim), jnp.float32)
        beta = 0.1 * jax.random.normal(kb, (1, dim), jnp.float32)
        mean = jnp.zeros((1, dim), jnp.float32)
        var = jnp.ones((1, dim), jnp.float32)
        scale = gamma / jnp.sqrt(var + eps)
        shift = beta - mean * scale
        return scale, shift

    s1, t1 = bn_fold(ks[2], ks[3], h1)
    s2, t2 = bn_fold(ks[4], ks[5], h2)
    return {
        "w1": 0.1 * jax.random.normal(ks[0], (c_in, h1), jnp.float32),
        "bn1_scale": s1, "bn1_shift": t1,
        "w2": 0.1 * jax.random.normal(ks[1], (h1, h2), jnp.float32),
        "bn2_scale": s2, "bn2_shift": t2,
        "w3": 0.1 * jax.random.normal(ks[6], (h2, c_out), jnp.float32),
        "b3": 0.05 * jax.random.normal(ks[7], (1, c_out), jnp.float32),
    }


def prepare_params(params, *, lane=128):
    """Fold BN scale into weights; pad w3 to 128 MXU lanes; cast to bf16."""
    c_out = params["w3"].shape[1]
    c_out_pad = pl.cdiv(c_out, lane) * lane
    pad = c_out_pad - c_out
    return {
        "w1": (params["w1"] * params["bn1_scale"]).astype(jnp.bfloat16),
        "t1": params["bn1_shift"].astype(jnp.float32),
        "w2": (params["w2"] * params["bn2_scale"]).astype(jnp.bfloat16),
        "t2": params["bn2_shift"].astype(jnp.float32),
        "w3": jnp.pad(params["w3"], ((0, 0), (0, pad))).astype(jnp.bfloat16),
        "b3": params["b3"].astype(jnp.float32),        # narrow (1, c_out)
        "c_out": c_out,
    }


def _reference(x, prep):
    """Pure-JAX reference of the same FC stack (bf16 operands, f32 math)."""
    f32 = lambda a: a.astype(jnp.float32)
    c_out = prep["c_out"]
    h = f32(x.astype(jnp.bfloat16)) @ f32(prep["w1"]) + prep["t1"]
    h = jnp.maximum(h, 0.0)
    h = f32(h.astype(jnp.bfloat16)) @ f32(prep["w2"]) + prep["t2"]
    h = jnp.maximum(h, 0.0)
    out = f32(h.astype(jnp.bfloat16)) @ f32(prep["w3"][:, :c_out]) + prep["b3"]
    return out


if __name__ == "__main__":
    key = jax.random.PRNGKey(0)
    k_x, k_p = jax.random.split(key)

    N, C_IN = 2000, 32         # N1+N2+... points (deliberately not tile-aligned)
    FC_CFG = (64, 64)          # model_cfg.CLS_FC-style hidden layers
    NUM_CLASS = 3              # output channels of the cls head

    x = jax.random.normal(k_x, (N, C_IN), jnp.float32)   # point features
    params = init_params(k_p, C_IN, FC_CFG, NUM_CLASS)
    prep = prepare_params(params)

    point_cls_preds = point_fc_layers(x, prep)
    point_cls_preds = jax.block_until_ready(point_cls_preds)

    ref = _reference(x, prep)
    assert point_cls_preds.shape == (N, NUM_CLASS)
    assert jnp.allclose(point_cls_preds, ref, atol=1e-3, rtol=1e-3)

    print("KERNEL_OK")
</pallas_src>

<mosaic_0001>
module attributes {stable_mosaic.version = 11 : i64} {
  func.func @_point_fc_kernel(%arg0: i32, %arg1: memref<512x32xf32, #tpu.memory_space<vmem>>, %arg2: memref<32x64xbf16, #tpu.memory_space<vmem>>, %arg3: memref<1x64xf32, #tpu.memory_space<vmem>>, %arg4: memref<64x64xbf16, #tpu.memory_space<vmem>>, %arg5: memref<1x64xf32, #tpu.memory_space<vmem>>, %arg6: memref<64x128xbf16, #tpu.memory_space<vmem>>, %arg7: memref<1x3xf32, #tpu.memory_space<vmem>>, %arg8: memref<512x3xf32, #tpu.memory_space<vmem>>) attributes {dimension_semantics = [#tpu.dimension_semantics<parallel>], iteration_bounds = array<i64: 4>, scalar_prefetch = 0 : i64, scratch_operands = 0 : i64, tpu.core_type = #tpu.core_type<tc>, window_params = [{transform_indices = @transform_0, window_bounds = array<i64: 512, 32>}, {pipeline_mode = #tpu.pipeline_mode<synchronous>, transform_indices = @transform_1, window_bounds = array<i64: 32, 64>}, {pipeline_mode = #tpu.pipeline_mode<synchronous>, transform_indices = @transform_2, window_bounds = array<i64: 1, 64>}, {pipeline_mode = #tpu.pipeline_mode<synchronous>, transform_indices = @transform_3, window_bounds = array<i64: 64, 64>}, {pipeline_mode = #tpu.pipeline_mode<synchronous>, transform_indices = @transform_4, window_bounds = array<i64: 1, 64>}, {pipeline_mode = #tpu.pipeline_mode<synchronous>, transform_indices = @transform_5, window_bounds = array<i64: 64, 128>}, {pipeline_mode = #tpu.pipeline_mode<synchronous>, transform_indices = @transform_6, window_bounds = array<i64: 1, 3>}, {transform_indices = @transform_7, window_bounds = array<i64: 512, 3>}]} {
    %c0 = arith.constant 0 : index
    %c0_0 = arith.constant 0 : index
    %0 = vector.load %arg1[%c0, %c0_0] : memref<512x32xf32, #tpu.memory_space<vmem>>, vector<512x32xf32>
    %1 = arith.truncf %0 : vector<512x32xf32> to vector<512x32xbf16>
    %c0_1 = arith.constant 0 : index
    %c0_2 = arith.constant 0 : index
    %2 = vector.load %arg2[%c0_1, %c0_2] : memref<32x64xbf16, #tpu.memory_space<vmem>>, vector<32x64xbf16>
    %cst = arith.constant dense<0.000000e+00> : vector<512x64xf32>
    %3 = tpu.matmul %1, %2, %cst {dimension_numbers = #tpu.dot_dimension_numbers<[1], [0], [0], [1], [0, 0, 1, 1], [], []>} : vector<512x32xbf16>, vector<32x64xbf16>, vector<512x64xf32> -> vector<512x64xf32>
    %c0_3 = arith.constant 0 : index
    %c0_4 = arith.constant 0 : index
    %4 = vector.load %arg3[%c0_3, %c0_4] : memref<1x64xf32, #tpu.memory_space<vmem>>, vector<1x64xf32>
    %5 = vector.broadcast %4 : vector<1x64xf32> to vector<512x64xf32>
    %6 = arith.addf %3, %5 : vector<512x64xf32>
    %cst_5 = arith.constant 0.000000e+00 : f32
    %7 = vector.broadcast %cst_5 : f32 to vector<512x64xf32>
    %8 = arith.maximumf %6, %7 : vector<512x64xf32>
    %9 = arith.truncf %8 : vector<512x64xf32> to vector<512x64xbf16>
    %c0_6 = arith.constant 0 : index
    %c0_7 = arith.constant 0 : index
    %10 = vector.load %arg4[%c0_6, %c0_7] : memref<64x64xbf16, #tpu.memory_space<vmem>>, vector<64x64xbf16>
    %cst_8 = arith.constant dense<0.000000e+00> : vector<512x64xf32>
    %11 = tpu.matmul %9, %10, %cst_8 {dimension_numbers = #tpu.dot_dimension_numbers<[1], [0], [0], [1], [0, 0, 1, 1], [], []>} : vector<512x64xbf16>, vector<64x64xbf16>, vector<512x64xf32> -> vector<512x64xf32>
    %c0_9 = arith.constant 0 : index
    %c0_10 = arith.constant 0 : index
    %12 = vector.load %arg5[%c0_9, %c0_10] : memref<1x64xf32, #tpu.memory_space<vmem>>, vector<1x64xf32>
    %13 = vector.broadcast %12 : vector<1x64xf32> to vector<512x64xf32>
    %14 = arith.addf %11, %13 : vector<512x64xf32>
    %cst_11 = arith.constant 0.000000e+00 : f32
    %15 = vector.broadcast %cst_11 : f32 to vector<512x64xf32>
    %16 = arith.maximumf %14, %15 : vector<512x64xf32>
    %17 = arith.truncf %16 : vector<512x64xf32> to vector<512x64xbf16>
    %c0_12 = arith.constant 0 : index
    %c0_13 = arith.constant 0 : index
    %18 = vector.load %arg6[%c0_12, %c0_13] : memref<64x128xbf16, #tpu.memory_space<vmem>>, vector<64x128xbf16>
    %cst_14 = arith.constant dense<0.000000e+00> : vector<512x128xf32>
    %19 = tpu.matmul %17, %18, %cst_14 {dimension_numbers = #tpu.dot_dimension_numbers<[1], [0], [0], [1], [0, 0, 1, 1], [], []>} : vector<512x64xbf16>, vector<64x128xbf16>, vector<512x128xf32> -> vector<512x128xf32>
    %20 = vector.extract_strided_slice %19 {offsets = [0, 0], sizes = [512, 3], strides = [1, 1]} : vector<512x128xf32> to vector<512x3xf32>
    %c0_15 = arith.constant 0 : index
    %c0_16 = arith.constant 0 : index
    %21 = vector.load %arg7[%c0_15, %c0_16] : memref<1x3xf32, #tpu.memory_space<vmem>>, vector<1x3xf32>
    %22 = vector.broadcast %21 : vector<1x3xf32> to vector<512x3xf32>
    %23 = arith.addf %20, %22 : vector<512x3xf32>
    %c0_17 = arith.constant 0 : index
    %c0_18 = arith.constant 0 : index
    %24 = vector.load %arg8[%c0_17, %c0_18] : memref<512x3xf32, #tpu.memory_space<vmem>>, vector<512x3xf32>
    tpu.vector_store %arg8[%c0_17, %c0_18], %23 {strides = array<i32>} : memref<512x3xf32, #tpu.memory_space<vmem>>, vector<512x3xf32>,
    return
  }
  func.func @transform_0(%arg0: i32) -> (i32, i32) {
    %c0_i32 = arith.constant 0 : i32
    %c0_i32_0 = arith.constant 0 : i32
    return %arg0, %c0_i32 : i32, i32
  }
  func.func @transform_1(%arg0: i32) -> (i32, i32) {
    %c0_i32 = arith.constant 0 : i32
    %c0_i32_0 = arith.constant 0 : i32
    %c0_i32_1 = arith.constant 0 : i32
    return %c0_i32, %c0_i32_0 : i32, i32
  }
  func.func @transform_2(%arg0: i32) -> (i32, i32) {
    %c0_i32 = arith.constant 0 : i32
    %c0_i32_0 = arith.constant 0 : i32
    %c0_i32_1 = arith.constant 0 : i32
    return %c0_i32, %c0_i32_0 : i32, i32
  }
  func.func @transform_3(%arg0: i32) -> (i32, i32) {
    %c0_i32 = arith.constant 0 : i32
    %c0_i32_0 = arith.constant 0 : i32
    %c0_i32_1 = arith.constant 0 : i32
    return %c0_i32, %c0_i32_0 : i32, i32
  }
  func.func @transform_4(%arg0: i32) -> (i32, i32) {
    %c0_i32 = arith.constant 0 : i32
    %c0_i32_0 = arith.constant 0 : i32
    %c0_i32_1 = arith.constant 0 : i32
    return %c0_i32, %c0_i32_0 : i32, i32
  }
  func.func @transform_5(%arg0: i32) -> (i32, i32) {
    %c0_i32 = arith.constant 0 : i32
    %c0_i32_0 = arith.constant 0 : i32
    %c0_i32_1 = arith.constant 0 : i32
    return %c0_i32, %c0_i32_0 : i32, i32
  }
  func.func @transform_6(%arg0: i32) -> (i32, i32) {
    %c0_i32 = arith.constant 0 : i32
    %c0_i32_0 = arith.constant 0 : i32
    %c0_i32_1 = arith.constant 0 : i32
    return %c0_i32, %c0_i32_0 : i32, i32
  }
  func.func @transform_7(%arg0: i32) -> (i32, i32) {
    %c0_i32 = arith.constant 0 : i32
    %c0_i32_0 = arith.constant 0 : i32
    return %arg0, %c0_i32 : i32, i32
  }
}

</mosaic_0001>

<bundles_post_ra>
// kernel: tpu_custom_call.1
= control target key start
LH: loop header
LB: loop body
LE: loop exit
PB: predicated region body
PF: predicated region fallthrough
CT: control target
= control target key end

     0   :  { %s3127_s24 = smov 0   ;;  %s3129_s25 = smov 0   ;;  %s3930_s0 = inlined_call_operand.vmem [shape: f32[2000,32], index: 0, kind: input, shape index: {}]   ;;  %s3931_s1 = inlined_call_operand.vmem [shape: bf16[32,64], index: 1, kind: input, shape index: {}]   ;;  %s3932_s2 = inlined_call_operand.vmem [shape: f32[1,64], index: 2, kind: input, shape index: {}]   ;;  %s3933_s3 = inlined_call_operand.vmem [shape: bf16[64,64], index: 3, kind: input, shape index: {}]   ;;  %s3934_s4 = inlined_call_operand.vmem [shape: f32[1,64], index: 4, kind: input, shape index: {}]   ;;  %s3935_s5 = inlined_call_operand.vmem [shape: bf16[64,128], index: 5, kind: input, shape index: {}]   ;;  %s3936_s6 = inlined_call_operand.vmem [shape: f32[1,3], index: 6, kind: input, shape index: {}]   ;;  %s3937_s7 = inlined_call_operand.vmem [shape: f32[2000,3], index: 7, kind: output, shape index: {}]  }
   0x1   :  { %s3131_s26 = smov 0  }
   0x2 LB: > { %s3140_s27 = sadd.s32 4294967295, %s3053_s26   ;;  %s3142_s28 = sadd.s32 1, %s3053_s26   ;;  %s3053_s26 = sphi %s3131_s26, %s3946_s26   ;;  %s3049_s25 = sphi %s3129_s25, %s3945_s25   ;;  %s3045_s24 = sphi %s3127_s24, %s3944_s24  }
   0x3   : > { %s173_s29 = ssub.s32 %s3053_s26, %s3142_s28  ;;  %s176_s30 = sadd.s32 1, %s3049_s25 }
   0x4   : > { %p174_p0 = scmp.eq.s32.totalorder %s173_s29, 0  ;;  %p186_p1 = scmp.ne.s32.totalorder %s3049_s25, %s3045_s24 }
   0x5   : > { %p187_p2 = scmp.eq.s32.totalorder %s3140_s27, 3  ;;  %p2446_p3 = scmp.ge.s32.totalorder %s3053_s26, 1 }
   0x6   : > { %s3150_s8 = scalar_select %p174_p0, %s3049_s25, %s176_s30  }
   0x7   : > { %p3152_p4 = por %p187_p2, %p186_p1  ;;  %p246_p5 = scmp.lt.s32.totalorder %s3053_s26, 5 }
   0x9   : > { %p247_p6 = pnand %p2446_p3, %p246_p5 }
   0xa   : > { %v2989_v0 = vld [vmem:[%s3931_s1] sm:$0xff] (!%p247_p6)   ;;  %s3160_s12 = sshll.u32 (!%p247_p6), %s3140_s27, 6  ;;  %v2990_v1 = vld [vmem:[%s3931_s1 + $0x8] sm:$0xff] (!%p247_p6)   ;;  %vm420_vm0 = vcmask (!%p247_p6), 261120   ;;  %v2993_v38 = vld [vmem:[%s3933_s3 + $0x10] sm:$0xff] (!%p247_p6)   ;;  %vm941_vm1 = vcmask (!%p247_p6), 523264  }
   0xb   : > { %250 = sbr.rel (%p247_p6) target bundleno = 880 (0x370), region = 48  ;;  %p286_p7 = scmp.lt.s32.totalorder (!%p247_p6), %s3160_s12, 249  ;;  %2685 = vmatprep.subr.bf16.mxu0 (!%p247_p6), %v2989_v0  ;;  %2897 = vmatprep.subr.bf16.mxu1 (!%p247_p6), %v2989_v0  ;;  %v2991_v2 = vld [vmem:[%s3933_s3] sm:$0xff] (!%p247_p6)   ;;  %v2992_v29 = vld [vmem:[%s3933_s3 + $0x8] sm:$0xff] (!%p247_p6)   ;;  %v2994_v40 = vld [vmem:[%s3933_s3 + $0x18] sm:$0xff] (!%p247_p6)   ;;  %vm1911_vm2 = vcmask (!%p247_p6), 23552  }
   0xc   : > { %2686 = vmatpush3.bf16.msra.mxu0 (!%p247_p6), %v2989_v0  ;;  %2899 = vmatpush3.bf16.msra.mxu1 (!%p247_p6), %v2989_v0  ;;  %s278_s26 = sand.u32 (!%p247_p6), 1, %s3045_s24  }
   0xd   : > { %2687 = vmatprep.subr.bf16.mxu0 (!%p247_p6), %v2990_v1  ;;  %2898 = vmatprep.subr.bf16.mxu1 (!%p247_p6), %v2990_v1  ;;  %s2447_s29 = sshll.u32 (!%p247_p6), %s278_s26, 9 }
   0xe   : > { %s3532_s11 = scalar_lea.vmem (!%p247_p6), [#allocation2], %s2447_s29  }
  0x10   : > { %2688 = vmatpush3.bf16.msra.mxu0 (!%p247_p6), %v2990_v1  ;;  %2900 = vmatpush3.bf16.msra.mxu1 (!%p247_p6), %v2990_v1 }
  0x11   : > { %2753 = vmatprep.subr.bf16.mxu1 (!%p247_p6), %v2991_v2 }
  0x12   : > { %s287_s15 = scalar_select %p286_p7, %s3160_s12, 249 }
  0x13   : > { %s1984_s24 = ssub.s32 (%p3152_p4), 250, %s3160_s12  ;;  %s2576_s13 = sshll.u32 (%p3152_p4), %s3140_s27, 9 }
  0x14   : > { %s2449_s18 = sshll.u32 %s287_s15, 3  ;;  %p1985_p8 = scmp.lt.s32.totalorder (%p3152_p4), %s1984_s24, 64 }
  0x15   : > { %s3173_s21 = scalar_lea.vmem %s3930_s0, %s2449_s18  ;;  %s3731_s16 = scalar_lea.vmem (%p3152_p4), %s3937_s7, %s2576_s13  }
  0x16   : > { %v301_v3 = vld [vmem:[%s3173_s21] sm:$0xff]  ;;  %v302_v4 = vld [vmem:[%s3173_s21 + $0x8] sm:$0xff]  ;;  %v303_v5 = vld [vmem:[%s3173_s21 + $0x10] sm:$0xff] }
  0x17   : > { %v365_v6 = vpack.c.bf16 %v302_v4, %v301_v3  ;;  %v304_v7 = vld [vmem:[%s3173_s21 + $0x18] sm:$0xff]  ;;  %v305_v8 = vld [vmem:[%s3173_s21 + $0x20] sm:$0xff]  ;;  %v306_v9 = vld [vmem:[%s3173_s21 + $0x28] sm:$0xff] }
  0x18   : > { %v366_v10 = vpack.c.bf16 %v304_v7, %v303_v5  ;;  %v367_v11 = vpack.c.bf16 %v306_v9, %v305_v8  ;;  %v307_v12 = vld [vmem:[%s3173_s21 + $0x30] sm:$0xff]  ;;  %v308_v13 = vld [vmem:[%s3173_s21 + $0x38] sm:$0xff]  ;;  %v309_v14 = vld [vmem:[%s3173_s21 + $0x40] sm:$0xff] }
  0x19   : > { %2689 = vmatprep.mubr.msk.bf16.mxu0 %vm420_vm0, %v365_v6  ;;  %v310_v15 = vld [vmem:[%s3173_s21 + $0x48] sm:$0xff]  ;;  %v368_v16 = vpack.c.bf16 %v308_v13, %v307_v12  ;;  %v333_v18 = vld [vmem:[%s3173_s21 + $0x100] sm:$0xff]  ;;  %v335_v20 = vld [vmem:[%s3173_s21 + $0x110] sm:$0xff] }
  0x1a   : > { %2690 = vmatmul.mubr.msk.bf16.vlgmr.msra.gmra.mrb[0].mxu0 %vm420_vm0, %v366_v10  ;;  %v369_v17 = vpack.c.bf16 %v310_v15, %v309_v14  ;;  %v334_v19 = vld [vmem:[%s3173_s21 + $0x108] sm:$0xff]  ;;  %v336_v21 = vld [vmem:[%s3173_s21 + $0x118] sm:$0xff]  ;;  %v337_v24 = vld [vmem:[%s3173_s21 + $0x120] sm:$0xff] }
  0x1b   : > { %2693 = vmatprep.mubr.msk.bf16.mxu0 %vm420_vm0, %v367_v11  ;;  %v381_v22 = vpack.c.bf16 %v334_v19, %v333_v18  ;;  %v382_v23 = vpack.c.bf16 %v336_v21, %v335_v20  ;;  %v338_v25 = vld [vmem:[%s3173_s21 + $0x128] sm:$0xff]  ;;  %v311_v26 = vld [vmem:[%s3173_s21 + $0x50] sm:$0xff]  ;;  %v312_v27 = vld [vmem:[%s3173_s21 + $0x58] sm:$0xff] }
  0x1c   : > { %v383_v28 = vpack.c.bf16 %v338_v25, %v337_v24  ;;  %v313_v30 = vld [vmem:[%s3173_s21 + $0x60] sm:$0xff]  ;;  %v314_v31 = vld [vmem:[%s3173_s21 + $0x68] sm:$0xff]  ;;  %v370_v32 = vpack.c.bf16 %v312_v27, %v311_v26  ;;  %v339_v33 = vld [vmem:[%s3173_s21 + $0x130] sm:$0xff] }
  0x1d   : > { %2721 = vmatprep.mubr.msk.bf16.mxu1 %vm420_vm0, %v381_v22  ;;  %v340_v34 = vld [vmem:[%s3173_s21 + $0x138] sm:$0xff]  ;;  %v371_v35 = vpack.c.bf16 %v314_v31, %v313_v30  ;;  %v341_v36 = vld [vmem:[%s3173_s21 + $0x140] sm:$0xff]  ;;  %v342_v37 = vld [vmem:[%s3173_s21 + $0x148] sm:$0xff] }
  0x1e   : > { %2722 = vmatmul.mubr.msk.bf16.vlgmr.msra.gmra.mrb[0].mxu1 %vm420_vm0, %v382_v23  ;;  %v384_v39 = vpack.c.bf16 %v340_v34, %v339_v33  ;;  %v315_v41 = vld [vmem:[%s3173_s21 + $0x70] sm:$0xff]  ;;  %v316_v42 = vld [vmem:[%s3173_s21 + $0x78] sm:$0xff]  ;;  %v317_v43 = vld [vmem:[%s3173_s21 + $0x80] sm:$0xff]  ;;  %v385_v44 = vpack.c.bf16 %v342_v37, %v341_v36 }
  0x1f   : > { %2725 = vmatprep.mubr.msk.bf16.mxu1 %vm420_vm0, %v383_v28  ;;  %2754 = vmatpush3.bf16.msra.mxu1 %v2991_v2  ;;  %v318_v45 = vld [vmem:[%s3173_s21 + $0x88] sm:$0xff]  ;;  %v372_v46 = vpack.c.bf16 %v316_v42, %v315_v41  ;;  %v343_v47 = vld [vmem:[%s3173_s21 + $0x150] sm:$0xff]  ;;  %v344_v48 = vld [vmem:[%s3173_s21 + $0x158] sm:$0xff] }
  0x20   : > { %2755 = vmatprep.subr.bf16.mxu1 %v2992_v29  ;;  %v373_v49 = vpack.c.bf16 %v318_v45, %v317_v43  ;;  %v345_v50 = vld [vmem:[%s3173_s21 + $0x160] sm:$0xff]  ;;  %v346_v51 = vld [vmem:[%s3173_s21 + $0x168] sm:$0xff]  ;;  %v386_v52 = vpack.c.bf16 %v344_v48, %v343_v47  ;;  %v319_v54 = vld [vmem:[%s3173_s21 + $0x90] sm:$0xff] }
  0x21   : > { %v387_v53 = vpack.c.bf16 %v346_v51, %v345_v50  ;;  %v320_v55 = vld [vmem:[%s3173_s21 + $0x98] sm:$0xff]  ;;  %v321_v56 = vld [vmem:[%s3173_s21 + $0xa0] sm:$0xff]  ;;  %v322_v57 = vld [vmem:[%s3173_s21 + $0xa8] sm:$0xff] }
  0x22   : > { %2694 = vmatmul.mubr.msk.bf16.gmra.mrb[4].mxu0 %vm420_vm0, %v368_v16  ;;  %v374_v58 = vpack.c.bf16 %v320_v55, %v319_v54  ;;  %v347_v59 = vld [vmem:[%s3173_s21 + $0x170] sm:$0xff]  ;;  %v348_v60 = vld [vmem:[%s3173_s21 + $0x178] sm:$0xff]  ;;  %v375_v61 = vpack.c.bf16 %v322_v57, %v321_v56  ;;  %v349_v62 = vld [vmem:[%s3173_s21 + $0x180] sm:$0xff] }
  0x23   : > { %2697 = vmatprep.mubr.msk.bf16.mxu0 %vm420_vm0, %v369_v17  ;;  %2756 = vmatpush3.bf16.msra.mxu1 %v2992_v29  ;;  %v350_v63 = vld [vmem:[%s3173_s21 + $0x188] sm:$0xff]  ;;  %v388_v0 = vpack.c.bf16 %v348_v60, %v347_v59  ;;  %v323_v2 = vld [vmem:[%s3173_s21 + $0xb0] sm:$0xff]  ;;  %v324_v3 = vld [vmem:[%s3173_s21 + $0xb8] sm:$0xff] }
  0x24   : > { %2757 = vmatprep.subr.bf16.mxu1 %v2993_v38  ;;  %v389_v1 = vpack.c.bf16 %v350_v63, %v349_v62  ;;  %v325_v4 = vld [vmem:[%s3173_s21 + $0xc0] sm:$0xff]  ;;  %v326_v5 = vld [vmem:[%s3173_s21 + $0xc8] sm:$0xff]  ;;  %v376_v6 = vpack.c.bf16 %v324_v3, %v323_v2  ;;  %v351_v7 = vld [vmem:[%s3173_s21 + $0x190] sm:$0xff] }
  0x25   : > { %v352_v8 = vld [vmem:[%s3173_s21 + $0x198] sm:$0xff]  ;;  %v377_v9 = vpack.c.bf16 %v326_v5, %v325_v4  ;;  %v353_v10 = vld [vmem:[%s3173_s21 + $0x1a0] sm:$0xff]  ;;  %v354_v11 = vld [vmem:[%s3173_s21 + $0x1a8] sm:$0xff] }
  0x26   : > { %2726 = vmatmul.mubr.msk.bf16.gmra.mrb[4].mxu1 %vm420_vm0, %v384_v39  ;;  %v390_v12 = vpack.c.bf16 %v352_v8, %v351_v7  ;;  %v391_v13 = vpack.c.bf16 %v354_v11, %v353_v10  ;;  %v327_v14 = vld [vmem:[%s3173_s21 + $0xd0] sm:$0xff]  ;;  %v328_v15 = vld [vmem:[%s3173_s21 + $0xd8] sm:$0xff]  ;;  %v329_v16 = vld [vmem:[%s3173_s21 + $0xe0] sm:$0xff] }
  0x27   : > { %2729 = vmatprep.mubr.msk.bf16.mxu1 %vm420_vm0, %v385_v44  ;;  %2758 = vmatpush3.bf16.msra.mxu1 %v2993_v38  ;;  %v330_v17 = vld [vmem:[%s3173_s21 + $0xe8] sm:$0xff]  ;;  %v378_v18 = vpack.c.bf16 %v328_v15, %v327_v14  ;;  %v355_v19 = vld [vmem:[%s3173_s21 + $0x1b0] sm:$0xff]  ;;  %v356_v20 = vld [vmem:[%s3173_s21 + $0x1b8] sm:$0xff] }
  0x28   : > { %2759 = vmatprep.subr.bf16.mxu1 %v2994_v40  ;;  %v379_v21 = vpack.c.bf16 %v330_v17, %v329_v16  ;;  %v357_v22 = vld [vmem:[%s3173_s21 + $0x1c0] sm:$0xff]  ;;  %v358_v23 = vld [vmem:[%s3173_s21 + $0x1c8] sm:$0xff]  ;;  %v392_v24 = vpack.c.bf16 %v356_v20, %v355_v19  ;;  %v331_v26 = vld [vmem:[%s3173_s21 + $0xf0] sm:$0xff] }
  0x29   : > { %v393_v25 = vpack.c.bf16 %v358_v23, %v357_v22  ;;  %v332_v27 = vld [vmem:[%s3173_s21 + $0xf8] sm:$0xff]  ;;  %v359_v29 = vld [vmem:[%s3173_s21 + $0x1d0] sm:$0xff]  ;;  %v361_v31 = vld [vmem:[%s3173_s21 + $0x1e0] sm:$0xff] }
  0x2a   : > { %2698 = vmatmul.mubr.msk.bf16.gmra.mrb[8].mxu0 %vm420_vm0, %v370_v32  ;;  %v380_v28 = vpack.c.bf16 %v332_v27, %v331_v26  ;;  %v360_v30 = vld [vmem:[%s3173_s21 + $0x1d8] sm:$0xff]  ;;  %v362_v32 = vld [vmem:[%s3173_s21 + $0x1e8] sm:$0xff]  ;;  %v3283_v38 = vld [vmem:[%s3932_s2] ss:$0 sm:$0xff] }
  0x2b   : > { %2701 = vmatprep.mubr.msk.bf16.mxu0 %vm420_vm0, %v371_v35  ;;  %2760 = vmatpush3.bf16.msra.mxu1 %v2994_v40  ;;  %v394_v33 = vpack.c.bf16 %v360_v30, %v359_v29  ;;  %v395_v34 = vpack.c.bf16 %v362_v32, %v361_v31  ;;  %v363_v35 = vld [vmem:[%s3173_s21 + $0x1f0] sm:$0xff]  ;;  %v364_v36 = vld [vmem:[%s3173_s21 + $0x1f8] sm:$0xff]  ;;  %v2996_v47 = vld [vmem:[%s3935_s5 + $0x8] sm:$0xff]  }
  0x2c   : > { %v396_v37 = vpack.c.bf16 %v364_v36, %v363_v35  ;;  %v2997_v54 = vld [vmem:[%s3935_s5 + $0x10] sm:$0xff]  }
  0x2e   : > { %2730 = vmatmul.mubr.msk.bf16.gmra.mrb[8].mxu1 %vm420_vm0, %v386_v52 }
  0x2f   : > { %2733 = vmatprep.mubr.msk.bf16.mxu1 %vm420_vm0, %v387_v53 }
  0x32   : > { %2702 = vmatmul.mubr.msk.bf16.gmra.mrb[12].mxu0 %vm420_vm0, %v372_v46  ;;  %v2995_v46 = vld [vmem:[%s3935_s5] sm:$0xff]  }
  0x33   : > { %2705 = vmatprep.mubr.msk.bf16.mxu0 %vm420_vm0, %v373_v49  ;;  %2825 = vmatprep.subr.bf16.mxu0 %v2995_v46 }
  0x34   : > { %2826 = vmatpush3.bf16.msra.mxu0 %v2995_v46 }
  0x35   : > { %2827 = vmatprep.subr.bf16.mxu0 %v2996_v47 }
  0x36   : > { %2734 = vmatmul.mubr.msk.bf16.gmra.mrb[12].mxu1 %vm420_vm0, %v388_v0  ;;  %v2998_v0 = vld [vmem:[%s3935_s5 + $0x18] sm:$0xff]  }
  0x37   : > { %2737 = vmatprep.mubr.msk.bf16.mxu1 %vm420_vm0, %v389_v1 }
  0x38   : > { %2828 = vmatpush3.bf16.msra.mxu0 %v2996_v47 }
  0x39   : > { %2829 = vmatprep.subr.bf16.mxu0 %v2997_v54 }
  0x3a   : > { %2706 = vmatmul.mubr.msk.bf16.gmra.mrb[16].mxu0 %vm420_vm0, %v374_v58 }
  0x3b   : > { %2709 = vmatprep.mubr.msk.bf16.mxu0 %vm420_vm0, %v375_v61 }
  0x3c   : > { %2830 = vmatpush3.bf16.msra.mxu0 %v2997_v54 }
  0x3d   : > { %2831 = vmatprep.subr.bf16.mxu0 %v2998_v0 }
  0x3e   : > { %2738 = vmatmul.mubr.msk.bf16.gmra.mrb[16].mxu1 %vm420_vm0, %v390_v12 }
  0x3f   : > { %2741 = vmatprep.mubr.msk.bf16.mxu1 %vm420_vm0, %v391_v13 }
  0x40   : > { %2832 = vmatpush3.bf16.msra.mxu0 %v2998_v0 }
  0x42   : > { %2710 = vmatmul.mubr.msk.bf16.gmra.mrb[20].mxu0 %vm420_vm0, %v376_v6 }
  0x43   : > { %2713 = vmatprep.mubr.msk.bf16.mxu0 %vm420_vm0, %v377_v9 }
  0x46   : > { %2742 = vmatmul.mubr.msk.bf16.gmra.mrb[20].mxu1 %vm420_vm0, %v392_v24 }
  0x47   : > { %2745 = vmatprep.mubr.msk.bf16.mxu1 %vm420_vm0, %v393_v25 }
  0x4a   : > { %2714 = vmatmul.mubr.msk.bf16.gmra.mrb[24].mxu0 %vm420_vm0, %v378_v18 }
  0x4b   : > { %2717 = vmatprep.mubr.msk.bf16.mxu0 %vm420_vm0, %v379_v21 }
  0x4e   : > { %2746 = vmatmul.mubr.msk.bf16.gmra.mrb[24].mxu1 %vm420_vm0, %v394_v33 }
  0x4f   : > { %2749 = vmatprep.mubr.msk.bf16.mxu1 %vm420_vm0, %v395_v34 }
  0x52   : > { %2718 = vmatmul.mubr.msk.bf16.gmra.mrb[28].mxu0 %vm420_vm0, %v380_v28 }
  0x56   : > { %2750 = vmatmul.mubr.msk.bf16.gmra.mrb[28].mxu1 %vm420_vm0, %v396_v37 }
  0xed   : > { %v2691_v39 = vpop.f32.mrb[0].mxu0 }
  0xee   : > { %v560_v40 = vadd.f32 %v2691_v39, %v3283_v38  ;;  %v551_v41 = vpop.f32.mrb[1].mxu0 }
  0xef   : > { %v552_v42 = vadd.f32 %v3283_v38, %v551_v41  ;;  %v2692_v43 = vpop.f32.mrb[2].mxu0 }
  0xf0   : > { %v563_v44 = vadd.f32 %v2692_v43, %v3283_v38  ;;  %v554_v45 = vpop.f32.mrb[3].mxu0  ;;  %v808_v49 = vmax.f32 %v560_v40, 0.0 }
  0xf1   : > { %v555_v48 = vadd.f32 %v3283_v38, %v554_v45  ;;  %v806_v51 = vmax.f32 %v552_v42, 0.0  ;;  %v2723_v63 = vpop.f32.mrb[0].mxu1 }
  0xf2   : > { %v809_v50 = vmax.f32 %v563_v44, 0.0  ;;  %v688_v2 = vadd.f32 %v2723_v63, %v3283_v38  ;;  %v679_v3 = vpop.f32.mrb[1].mxu1 }
  0xf3   : > { %v807_v52 = vmax.f32 %v555_v48, 0.0  ;;  %v680_v6 = vadd.f32 %v3283_v38, %v679_v3  ;;  %v2724_v7 = vpop.f32.mrb[2].mxu1 }
  0xf4   : > { %v871_v53 = vpack.c.bf16 %v809_v50, %v808_v49  ;;  %v840_v10 = vmax.f32 %v688_v2, 0.0  ;;  %v691_v11 = vadd.f32 %v2724_v7, %v3283_v38  ;;  %v682_v12 = vpop.f32.mrb[3].mxu1 }
  0xf5   : > { %v870_v55 = vpack.c.bf16 %v807_v52, %v806_v51  ;;  %v2695_v56 = vpop.f32.mrb[4].mxu0  ;;  %v838_v14 = vmax.f32 %v680_v6, 0.0  ;;  %v683_v15 = vadd.f32 %v3283_v38, %v682_v12 }
  0xf6   : > { %v576_v57 = vadd.f32 %v2695_v56, %v3283_v38  ;;  %v567_v58 = vpop.f32.mrb[5].mxu0  ;;  %v841_v18 = vmax.f32 %v691_v11, 0.0 }
  0xf7   : > { %v568_v59 = vadd.f32 %v3283_v38, %v567_v58  ;;  %v2696_v60 = vpop.f32.mrb[6].mxu0  ;;  %2761 = vmatprep.mubr.msk.bf16.mxu1 %vm941_vm1, %v870_v55  ;;  %v839_v21 = vmax.f32 %v683_v15, 0.0 }
  0xf8   : > { %v579_v61 = vadd.f32 %v2696_v60, %v3283_v38  ;;  %v570_v62 = vpop.f32.mrb[7].mxu0  ;;  %2762 = vmatmul.mubr.msk.bf16.vlgmr.msra.gmra.mrb[32].mxu1 %vm941_vm1, %v871_v53  ;;  %v812_v4 = vmax.f32 %v576_v57, 0.0  ;;  %v3314_v24 = vpack.c.bf16 %v841_v18, %v840_v10 }
  0xf9   : > { %v571_v1 = vadd.f32 %v3283_v38, %v570_v62  ;;  %v810_v8 = vmax.f32 %v568_v59, 0.0  ;;  %v3318_v27 = vpack.c.bf16 %v839_v21, %v838_v14  ;;  %v2727_v28 = vpop.f32.mrb[4].mxu1 }
  0xfa   : > { %v813_v5 = vmax.f32 %v579_v61, 0.0  ;;  %v704_v30 = vadd.f32 %v2727_v28, %v3283_v38  ;;  %v695_v31 = vpop.f32.mrb[5].mxu1 }
  0xfb   : > { %v811_v9 = vmax.f32 %v571_v1, 0.0  ;;  %v696_v34 = vadd.f32 %v3283_v38, %v695_v31  ;;  %v2728_v35 = vpop.f32.mrb[6].mxu1 }
  0xfc   : > { %v873_v13 = vpack.c.bf16 %v813_v5, %v812_v4  ;;  %v844_v39 = vmax.f32 %v704_v30, 0.0  ;;  %v707_v40 = vadd.f32 %v2728_v35, %v3283_v38  ;;  %v698_v41 = vpop.f32.mrb[7].mxu1 }
  0xfd   : > { %v872_v16 = vpack.c.bf16 %v811_v9, %v810_v8  ;;  %v2699_v17 = vpop.f32.mrb[8].mxu0  ;;  %v842_v43 = vmax.f32 %v696_v34, 0.0  ;;  %v699_v44 = vadd.f32 %v3283_v38, %v698_v41 }
  0xfe   : > { %v592_v19 = vadd.f32 %v2699_v17, %v3283_v38  ;;  %v583_v20 = vpop.f32.mrb[9].mxu0  ;;  %v845_v47 = vmax.f32 %v707_v40, 0.0 }
  0xff   : > { %v584_v22 = vadd.f32 %v3283_v38, %v583_v20  ;;  %v2700_v23 = vpop.f32.mrb[10].mxu0  ;;  %2765 = vmatprep.mubr.msk.bf16.mxu1 %vm941_vm1, %v872_v16  ;;  %v843_v50 = vmax.f32 %v699_v44, 0.0 }
 0x100   : > { %v595_v25 = vadd.f32 %v2700_v23, %v3283_v38  ;;  %v586_v26 = vpop.f32.mrb[11].mxu0  ;;  %2766 = vmatmul.mubr.msk.bf16.gmra.mrb[36].mxu1 %vm941_vm1, %v873_v13  ;;  %v816_v32 = vmax.f32 %v592_v19, 0.0  ;;  %v3328_v53 = vpack.c.bf16 %v845_v47, %v844_v39 }
 0x101   : > { %v587_v29 = vadd.f32 %v3283_v38, %v586_v26  ;;  %v814_v36 = vmax.f32 %v584_v22, 0.0  ;;  %v3332_v56 = vpack.c.bf16 %v843_v50, %v842_v43  ;;  %v2731_v57 = vpop.f32.mrb[8].mxu1 }
 0x102   : > { %v817_v33 = vmax.f32 %v595_v25, 0.0  ;;  %v720_v59 = vadd.f32 %v2731_v57, %v3283_v38  ;;  %v711_v60 = vpop.f32.mrb[9].mxu1 }
 0x103   : > { %v815_v37 = vmax.f32 %v587_v29, 0.0  ;;  %v712_v63 = vadd.f32 %v3283_v38, %v711_v60  ;;  %v2732_v0 = vpop.f32.mrb[10].mxu1 }
 0x104   : > { %v875_v42 = vpack.c.bf16 %v817_v33, %v816_v32  ;;  %v848_v3 = vmax.f32 %v720_v59, 0.0  ;;  %v723_v4 = vadd.f32 %v2732_v0, %v3283_v38  ;;  %v714_v5 = vpop.f32.mrb[11].mxu1 }
 0x105   : > { %v874_v45 = vpack.c.bf16 %v815_v37, %v814_v36  ;;  %v2703_v46 = vpop.f32.mrb[12].mxu0  ;;  %v846_v7 = vmax.f32 %v712_v63, 0.0  ;;  %v715_v8 = vadd.f32 %v3283_v38, %v714_v5 }
 0x106   : > { %v608_v48 = vadd.f32 %v2703_v46, %v3283_v38  ;;  %v599_v49 = vpop.f32.mrb[13].mxu0  ;;  %v849_v11 = vmax.f32 %v723_v4, 0.0 }
 0x107   : > { %v600_v51 = vadd.f32 %v3283_v38, %v599_v49  ;;  %v2704_v52 = vpop.f32.mrb[14].mxu0  ;;  %2769 = vmatprep.mubr.msk.bf16.mxu1 %vm941_vm1, %v874_v45  ;;  %v847_v14 = vmax.f32 %v715_v8, 0.0 }
 0x108   : > { %v611_v54 = vadd.f32 %v2704_v52, %v3283_v38  ;;  %v602_v55 = vpop.f32.mrb[15].mxu0  ;;  %2770 = vmatmul.mubr.msk.bf16.gmra.mrb[40].mxu1 %vm941_vm1, %v875_v42  ;;  %v820_v61 = vmax.f32 %v608_v48, 0.0  ;;  %v3342_v17 = vpack.c.bf16 %v849_v11, %v848_v3 }
 0x109   : > { %v603_v58 = vadd.f32 %v3283_v38, %v602_v55  ;;  %v818_v1 = vmax.f32 %v600_v51, 0.0  ;;  %v3346_v20 = vpack.c.bf16 %v847_v14, %v846_v7  ;;  %v2735_v21 = vpop.f32.mrb[12].mxu1 }
 0x10a   : > { %v821_v62 = vmax.f32 %v611_v54, 0.0  ;;  %v736_v23 = vadd.f32 %v2735_v21, %v3283_v38  ;;  %v727_v25 = vpop.f32.mrb[13].mxu1 }
 0x10b   : > { %v819_v2 = vmax.f32 %v603_v58, 0.0  ;;  %v728_v29 = vadd.f32 %v3283_v38, %v727_v25  ;;  %v2736_v30 = vpop.f32.mrb[14].mxu1 }
 0x10c   : > { %v877_v6 = vpack.c.bf16 %v821_v62, %v820_v61  ;;  %v852_v33 = vmax.f32 %v736_v23, 0.0  ;;  %v739_v34 = vadd.f32 %v2736_v30, %v3283_v38  ;;  %v730_v35 = vpop.f32.mrb[15].mxu1 }
 0x10d   : > { %v876_v9 = vpack.c.bf16 %v819_v2, %v818_v1  ;;  %v2707_v10 = vpop.f32.mrb[16].mxu0  ;;  %v850_v37 = vmax.f32 %v728_v29, 0.0  ;;  %v731_v39 = vadd.f32 %v3283_v38, %v730_v35 }
 0x10e   : > { %v624_v12 = vadd.f32 %v2707_v10, %v3283_v38  ;;  %v615_v13 = vpop.f32.mrb[17].mxu0  ;;  %v853_v42 = vmax.f32 %v739_v34, 0.0 }
 0x10f   : > { %v616_v15 = vadd.f32 %v3283_v38, %v615_v13  ;;  %v2708_v16 = vpop.f32.mrb[18].mxu0  ;;  %2773 = vmatprep.mubr.msk.bf16.mxu1 %vm941_vm1, %v876_v9  ;;  %v851_v45 = vmax.f32 %v731_v39, 0.0 }
 0x110   : > { %v627_v18 = vadd.f32 %v2708_v16, %v3283_v38  ;;  %v618_v19 = vpop.f32.mrb[19].mxu0  ;;  %2774 = vmatmul.mubr.msk.bf16.gmra.mrb[44].mxu1 %vm941_vm1, %v877_v6  ;;  %v824_v26 = vmax.f32 %v624_v12, 0.0  ;;  %v3356_v48 = vpack.c.bf16 %v853_v42, %v852_v33 }
 0x111   : > { %v619_v22 = vadd.f32 %v3283_v38, %v618_v19  ;;  %v822_v31 = vmax.f32 %v616_v15, 0.0  ;;  %v3360_v51 = vpack.c.bf16 %v851_v45, %v850_v37  ;;  %v2739_v52 = vpop.f32.mrb[16].mxu1 }
 0x112   : > { %v825_v28 = vmax.f32 %v627_v18, 0.0  ;;  %v752_v55 = vadd.f32 %v2739_v52, %v3283_v38  ;;  %v743_v57 = vpop.f32.mrb[17].mxu1 }
 0x113   : > { %v823_v32 = vmax.f32 %v619_v22, 0.0  ;;  %v744_v60 = vadd.f32 %v3283_v38, %v743_v57  ;;  %v2740_v61 = vpop.f32.mrb[18].mxu1 }
 0x114   : > { %v879_v36 = vpack.c.bf16 %v825_v28, %v824_v26  ;;  %v856_v0 = vmax.f32 %v752_v55, 0.0  ;;  %v755_v1 = vadd.f32 %v2740_v61, %v3283_v38  ;;  %v746_v2 = vpop.f32.mrb[19].mxu1 }
 0x115   : > { %v878_v40 = vpack.c.bf16 %v823_v32, %v822_v31  ;;  %v2711_v41 = vpop.f32.mrb[20].mxu0  ;;  %v854_v4 = vmax.f32 %v744_v60, 0.0  ;;  %v747_v5 = vadd.f32 %v3283_v38, %v746_v2 }
 0x116   : > { %v640_v43 = vadd.f32 %v2711_v41, %v3283_v38  ;;  %v631_v44 = vpop.f32.mrb[21].mxu0  ;;  %v857_v8 = vmax.f32 %v755_v1, 0.0 }
 0x117   : > { %v632_v46 = vadd.f32 %v3283_v38, %v631_v44  ;;  %v2712_v47 = vpop.f32.mrb[22].mxu0  ;;  %2777 = vmatprep.mubr.msk.bf16.mxu1 %vm941_vm1, %v878_v40  ;;  %v855_v11 = vmax.f32 %v747_v5, 0.0 }
 0x118   : > { %v643_v49 = vadd.f32 %v2712_v47, %v3283_v38  ;;  %v634_v50 = vpop.f32.mrb[23].mxu0  ;;  %2778 = vmatmul.mubr.msk.bf16.gmra.mrb[48].mxu1 %vm941_vm1, %v879_v36  ;;  %v828_v58 = vmax.f32 %v640_v43, 0.0  ;;  %v3370_v14 = vpack.c.bf16 %v857_v8, %v856_v0 }
 0x119   : > { %v635_v54 = vadd.f32 %v3283_v38, %v634_v50  ;;  %v826_v62 = vmax.f32 %v632_v46, 0.0  ;;  %v3374_v18 = vpack.c.bf16 %v855_v11, %v854_v4  ;;  %v2743_v19 = vpop.f32.mrb[20].mxu1 }
 0x11a   : > { %v829_v59 = vmax.f32 %v643_v49, 0.0  ;;  %v768_v22 = vadd.f32 %v2743_v19, %v3283_v38  ;;  %v759_v23 = vpop.f32.mrb[21].mxu1 }
 0x11b   : > { %v827_v63 = vmax.f32 %v635_v54, 0.0  ;;  %v760_v28 = vadd.f32 %v3283_v38, %v759_v23  ;;  %v2744_v29 = vpop.f32.mrb[22].mxu1 }
 0x11c   : > { %v881_v3 = vpack.c.bf16 %v829_v59, %v828_v58  ;;  %v860_v32 = vmax.f32 %v768_v22, 0.0  ;;  %v771_v33 = vadd.f32 %v2744_v29, %v3283_v38  ;;  %v762_v34 = vpop.f32.mrb[23].mxu1 }
 0x11d   : > { %v880_v6 = vpack.c.bf16 %v827_v63, %v826_v62  ;;  %v2715_v7 = vpop.f32.mrb[24].mxu0  ;;  %v858_v36 = vmax.f32 %v760_v28, 0.0  ;;  %v763_v37 = vadd.f32 %v3283_v38, %v762_v34 }
 0x11e   : > { %v656_v9 = vadd.f32 %v2715_v7, %v3283_v38  ;;  %v647_v10 = vpop.f32.mrb[25].mxu0  ;;  %v861_v41 = vmax.f32 %v771_v33, 0.0 }
 0x11f   : > { %v648_v12 = vadd.f32 %v3283_v38, %v647_v10  ;;  %v2716_v13 = vpop.f32.mrb[26].mxu0  ;;  %2781 = vmatprep.mubr.msk.bf16.mxu1 %vm941_vm1, %v880_v6  ;;  %v859_v44 = vmax.f32 %v763_v37, 0.0 }
 0x120   : > { %v659_v15 = vadd.f32 %v2716_v13, %v3283_v38  ;;  %v650_v16 = vpop.f32.mrb[27].mxu0  ;;  %2782 = vmatmul.mubr.msk.bf16.gmra.mrb[52].mxu1 %vm941_vm1, %v881_v3  ;;  %v832_v25 = vmax.f32 %v656_v9, 0.0  ;;  %v897_v47 = vpack.c.bf16 %v861_v41, %v860_v32 }
 0x121   : > { %v651_v21 = vadd.f32 %v3283_v38, %v650_v16  ;;  %v830_v30 = vmax.f32 %v648_v12, 0.0  ;;  %v896_v52 = vpack.c.bf16 %v859_v44, %v858_v36  ;;  %v2747_v54 = vpop.f32.mrb[24].mxu1 }
 0x122   : > { %v833_v26 = vmax.f32 %v659_v15, 0.0  ;;  %v784_v57 = vadd.f32 %v2747_v54, %v3283_v38  ;;  %v775_v58 = vpop.f32.mrb[25].mxu1 }
 0x123   : > { %v831_v31 = vmax.f32 %v651_v21, 0.0  ;;  %v776_v61 = vadd.f32 %v3283_v38, %v775_v58  ;;  %v2748_v62 = vpop.f32.mrb[26].mxu1 }
 0x124   : > { %v883_v35 = vpack.c.bf16 %v833_v26, %v832_v25  ;;  %v864_v1 = vmax.f32 %v784_v57, 0.0  ;;  %v787_v2 = vadd.f32 %v2748_v62, %v3283_v38  ;;  %v778_v3 = vpop.f32.mrb[27].mxu1 }
 0x125   : > { %v882_v39 = vpack.c.bf16 %v831_v31, %v830_v30  ;;  %v2719_v40 = vpop.f32.mrb[28].mxu0  ;;  %v862_v5 = vmax.f32 %v776_v61, 0.0  ;;  %v779_v6 = vadd.f32 %v3283_v38, %v778_v3 }
 0x126   : > { %v672_v42 = vadd.f32 %v2719_v40, %v3283_v38  ;;  %v663_v43 = vpop.f32.mrb[29].mxu0  ;;  %v865_v8 = vmax.f32 %v787_v2, 0.0 }
 0x127   : > { %v664_v45 = vadd.f32 %v3283_v38, %v663_v43  ;;  %v2720_v46 = vpop.f32.mrb[30].mxu0  ;;  %2785 = vmatprep.mubr.msk.bf16.mxu1 %vm941_vm1, %v882_v39  ;;  %v863_v9 = vmax.f32 %v779_v6, 0.0 }
 0x128   : > { %v675_v49 = vadd.f32 %v2720_v46, %v3283_v38  ;;  %v666_v50 = vpop.f32.mrb[31].mxu0  ;;  %2786 = vmatmul.mubr.msk.bf16.gmra.mrb[56].mxu1 %vm941_vm1, %v883_v35  ;;  %v836_v59 = vmax.f32 %v672_v42, 0.0  ;;  %v899_v10 = vpack.c.bf16 %v865_v8, %v864_v1 }
 0x129   : > { %v667_v55 = vadd.f32 %v3283_v38, %v666_v50  ;;  %v834_v63 = vmax.f32 %v664_v45, 0.0  ;;  %v898_v11 = vpack.c.bf16 %v863_v9, %v862_v5  ;;  %v2751_v12 = vpop.f32.mrb[28].mxu1 }
 0x12a   : > { %v837_v60 = vmax.f32 %v675_v49, 0.0  ;;  %v800_v13 = vadd.f32 %v2751_v12, %v3283_v38  ;;  %v791_v15 = vpop.f32.mrb[29].mxu1 }
 0x12b   : > { %v835_v0 = vmax.f32 %v667_v55, 0.0  ;;  %v792_v16 = vadd.f32 %v3283_v38, %v791_v15  ;;  %v2752_v19 = vpop.f32.mrb[30].mxu1 }
 0x12c   : > { %v885_v4 = vpack.c.bf16 %v837_v60, %v836_v59  ;;  %v868_v21 = vmax.f32 %v800_v13, 0.0  ;;  %v803_v22 = vadd.f32 %v2752_v19, %v3283_v38  ;;  %v794_v23 = vpop.f32.mrb[31].mxu1 }
 0x12d   : > { %v884_v7 = vpack.c.bf16 %v835_v0, %v834_v63  ;;  %v866_v25 = vmax.f32 %v792_v16, 0.0  ;;  %v795_v26 = vadd.f32 %v3283_v38, %v794_v23  ;;  %v3426_v38 = vld [vmem:[%s3934_s4] ss:$0 sm:$0xff] }
 0x12e   : > { %v869_v28 = vmax.f32 %v803_v22, 0.0 }
 0x12f   : > { %2789 = vmatprep.mubr.msk.bf16.mxu1 %vm941_vm1, %v884_v7  ;;  %v867_v29 = vmax.f32 %v795_v26, 0.0 }
 0x130   : > { %2790 = vmatmul.mubr.msk.bf16.gmra.mrb[60].mxu1 %vm941_vm1, %v885_v4  ;;  %v901_v30 = vpack.c.bf16 %v869_v28, %v868_v21 }
 0x131   : > { %2793 = vmatprep.mubr.msk.bf16.mxu1 %vm941_vm1, %v3318_v27  ;;  %v900_v27 = vpack.c.bf16 %v867_v29, %v866_v25 }
 0x138   : > { %2794 = vmatmul.mubr.msk.bf16.gmra.mrb[64].mxu1 %vm941_vm1, %v3314_v24 }
 0x139   : > { %2797 = vmatprep.mubr.msk.bf16.mxu1 %vm941_vm1, %v3332_v56 }
 0x140   : > { %2798 = vmatmul.mubr.msk.bf16.gmra.mrb[68].mxu1 %vm941_vm1, %v3328_v53 }
 0x141   : > { %2801 = vmatprep.mubr.msk.bf16.mxu1 %vm941_vm1, %v3346_v20 }
 0x148   : > { %2802 = vmatmul.mubr.msk.bf16.gmra.mrb[72].mxu1 %vm941_vm1, %v3342_v17 }
 0x149   : > { %2805 = vmatprep.mubr.msk.bf16.mxu1 %vm941_vm1, %v3360_v51 }
 0x150   : > { %2806 = vmatmul.mubr.msk.bf16.gmra.mrb[76].mxu1 %vm941_vm1, %v3356_v48 }
 0x151   : > { %2809 = vmatprep.mubr.msk.bf16.mxu1 %vm941_vm1, %v3374_v18 }
 0x158   : > { %2810 = vmatmul.mubr.msk.bf16.gmra.mrb[80].mxu1 %vm941_vm1, %v3370_v14 }
 0x159   : > { %2813 = vmatprep.mubr.msk.bf16.mxu1 %vm941_vm1, %v896_v52 }
 0x160   : > { %2814 = vmatmul.mubr.msk.bf16.gmra.mrb[84].mxu1 %vm941_vm1, %v897_v47 }
 0x161   : > { %2817 = vmatprep.mubr.msk.bf16.mxu1 %vm941_vm1, %v898_v11 }
 0x168   : > { %2818 = vmatmul.mubr.msk.bf16.gmra.mrb[88].mxu1 %vm941_vm1, %v899_v10 }
 0x169   : > { %2821 = vmatprep.mubr.msk.bf16.mxu1 %vm941_vm1, %v900_v27 }
 0x170   : > { %2822 = vmatmul.mubr.msk.bf16.gmra.mrb[92].mxu1 %vm941_vm1, %v901_v30 }
 0x1cb   : > { %v2763_v24 = vpop.f32.mrb[32].mxu1 }
 0x1cc   : > { %v1081_v53 = vadd.f32 %v2763_v24, %v3426_v38  ;;  %v1072_v56 = vpop.f32.mrb[33].mxu1 }
 0x1cd   : > { %v1073_v17 = vadd.f32 %v3426_v38, %v1072_v56  ;;  %v2764_v20 = vpop.f32.mrb[34].mxu1 }
 0x1ce   : > { %v1084_v48 = vadd.f32 %v2764_v20, %v3426_v38  ;;  %v1075_v51 = vpop.f32.mrb[35].mxu1  ;;  %v1329_v18 = vmax.f32 %v1081_v53, 0.0 }
 0x1cf   : > { %v1076_v14 = vadd.f32 %v3426_v38, %v1075_v51  ;;  %v1327_v32 = vmax.f32 %v1073_v17, 0.0 }
 0x1d0   : > { %v1330_v31 = vmax.f32 %v1084_v48, 0.0 }
 0x1d1   : > { %v1328_v33 = vmax.f32 %v1076_v14, 0.0 }
 0x1d2   : > { %v1392_v34 = vpack.c.bf16 %v1330_v31, %v1329_v18 }
 0x1d3   : > { %v1391_v35 = vpack.c.bf16 %v1328_v33, %v1327_v32  ;;  %v2767_v36 = vpop.f32.mrb[36].mxu1 }
 0x1d4   : > { %v1097_v37 = vadd.f32 %v2767_v36, %v3426_v38  ;;  %v1088_v39 = vpop.f32.mrb[37].mxu1 }
 0x1d5   : > { %v1089_v40 = vadd.f32 %v3426_v38, %v1088_v39  ;;  %v2768_v41 = vpop.f32.mrb[38].mxu1  ;;  %2833 = vmatprep.mubr.msk.bf16.mxu0 %vm941_vm1, %v1391_v35 }
 0x1d6   : > { %v1100_v42 = vadd.f32 %v2768_v41, %v3426_v38  ;;  %v1091_v43 = vpop.f32.mrb[39].mxu1  ;;  %2834 = vmatmul.mubr.msk.bf16.vlgmr.msra.gmra.mrb[32].mxu0 %vm941_vm1, %v1392_v34  ;;  %v1333_v45 = vmax.f32 %v1097_v37, 0.0 }
 0x1d7   : > { %v1092_v44 = vadd.f32 %v3426_v38, %v1091_v43  ;;  %v1331_v47 = vmax.f32 %v1089_v40, 0.0 }
 0x1d8   : > { %v1334_v46 = vmax.f32 %v1100_v42, 0.0 }
 0x1d9   : > { %v1332_v49 = vmax.f32 %v1092_v44, 0.0 }
 0x1da   : > { %v1394_v50 = vpack.c.bf16 %v1334_v46, %v1333_v45 }
 0x1db   : > { %v1393_v52 = vpack.c.bf16 %v1332_v49, %v1331_v47  ;;  %v2771_v54 = vpop.f32.mrb[40].mxu1 }
 0x1dc   : > { %v1113_v55 = vadd.f32 %v2771_v54, %v3426_v38  ;;  %v1104_v57 = vpop.f32.mrb[41].mxu1 }
 0x1dd   : > { %v1105_v58 = vadd.f32 %v3426_v38, %v1104_v57  ;;  %v2772_v59 = vpop.f32.mrb[42].mxu1  ;;  %2837 = vmatprep.mubr.msk.bf16.mxu0 %vm941_vm1, %v1393_v52 }
 0x1de   : > { %v1116_v60 = vadd.f32 %v2772_v59, %v3426_v38  ;;  %v1107_v61 = vpop.f32.mrb[43].mxu1  ;;  %2838 = vmatmul.mubr.msk.bf16.gmra.mrb[36].mxu0 %vm941_vm1, %v1394_v50  ;;  %v1337_v63 = vmax.f32 %v1113_v55, 0.0 }
 0x1df   : > { %v1108_v62 = vadd.f32 %v3426_v38, %v1107_v61  ;;  %v1335_v1 = vmax.f32 %v1105_v58, 0.0 }
 0x1e0   : > { %v1338_v0 = vmax.f32 %v1116_v60, 0.0 }
 0x1e1   : > { %v1336_v2 = vmax.f32 %v1108_v62, 0.0 }
 0x1e2   : > { %v1396_v3 = vpack.c.bf16 %v1338_v0, %v1337_v63 }
 0x1e3   : > { %v1395_v4 = vpack.c.bf16 %v1336_v2, %v1335_v1  ;;  %v2775_v5 = vpop.f32.mrb[44].mxu1 }
 0x1e4   : > { %v1129_v6 = vadd.f32 %v2775_v5, %v3426_v38  ;;  %v1120_v7 = vpop.f32.mrb[45].mxu1 }
 0x1e5   : > { %v1121_v8 = vadd.f32 %v3426_v38, %v1120_v7  ;;  %v2776_v9 = vpop.f32.mrb[46].mxu1  ;;  %2841 = vmatprep.mubr.msk.bf16.mxu0 %vm941_vm1, %v1395_v4 }
 0x1e6   : > { %v1132_v10 = vadd.f32 %v2776_v9, %v3426_v38  ;;  %v1123_v11 = vpop.f32.mrb[47].mxu1  ;;  %2842 = vmatmul.mubr.msk.bf16.gmra.mrb[40].mxu0 %vm941_vm1, %v1396_v3  ;;  %v1341_v13 = vmax.f32 %v1129_v6, 0.0 }
 0x1e7   : > { %v1124_v12 = vadd.f32 %v3426_v38, %v1123_v11  ;;  %v1339_v16 = vmax.f32 %v1121_v8, 0.0 }
 0x1e8   : > { %v1342_v15 = vmax.f32 %v1132_v10, 0.0 }
 0x1e9   : > { %v1340_v19 = vmax.f32 %v1124_v12, 0.0 }
 0x1ea   : > { %v1398_v21 = vpack.c.bf16 %v1342_v15, %v1341_v13 }
 0x1eb   : > { %v1397_v22 = vpack.c.bf16 %v1340_v19, %v1339_v16  ;;  %v2779_v23 = vpop.f32.mrb[48].mxu1 }
 0x1ec   : > { %v1145_v25 = vadd.f32 %v2779_v23, %v3426_v38  ;;  %v1136_v26 = vpop.f32.mrb[49].mxu1 }
 0x1ed   : > { %v1137_v28 = vadd.f32 %v3426_v38, %v1136_v26  ;;  %v2780_v29 = vpop.f32.mrb[50].mxu1  ;;  %2845 = vmatprep.mubr.msk.bf16.mxu0 %vm941_vm1, %v1397_v22 }
 0x1ee   : > { %v1148_v30 = vadd.f32 %v2780_v29, %v3426_v38  ;;  %v1139_v27 = vpop.f32.mrb[51].mxu1  ;;  %2846 = vmatmul.mubr.msk.bf16.gmra.mrb[44].mxu0 %vm941_vm1, %v1398_v21  ;;  %v1345_v53 = vmax.f32 %v1145_v25, 0.0 }
 0x1ef   : > { %v1140_v24 = vadd.f32 %v3426_v38, %v1139_v27  ;;  %v1343_v17 = vmax.f32 %v1137_v28, 0.0 }
 0x1f0   : > { %v1346_v56 = vmax.f32 %v1148_v30, 0.0 }
 0x1f1   : > { %v1344_v20 = vmax.f32 %v1140_v24, 0.0 }
 0x1f2   : > { %v1400_v48 = vpack.c.bf16 %v1346_v56, %v1345_v53 }
 0x1f3   : > { %v1399_v51 = vpack.c.bf16 %v1344_v20, %v1343_v17  ;;  %v2783_v14 = vpop.f32.mrb[52].mxu1 }
 0x1f4   : > { %v1161_v18 = vadd.f32 %v2783_v14, %v3426_v38  ;;  %v1152_v31 = vpop.f32.mrb[53].mxu1 }
 0x1f5   : > { %v1153_v32 = vadd.f32 %v3426_v38, %v1152_v31  ;;  %v2784_v33 = vpop.f32.mrb[54].mxu1  ;;  %2849 = vmatprep.mubr.msk.bf16.mxu0 %vm941_vm1, %v1399_v51 }
 0x1f6   : > { %v1164_v34 = vadd.f32 %v2784_v33, %v3426_v38  ;;  %v1155_v35 = vpop.f32.mrb[55].mxu1  ;;  %2850 = vmatmul.mubr.msk.bf16.gmra.mrb[48].mxu0 %vm941_vm1, %v1400_v48  ;;  %v1349_v37 = vmax.f32 %v1161_v18, 0.0 }
 0x1f7   : > { %v1156_v36 = vadd.f32 %v3426_v38, %v1155_v35  ;;  %v1347_v40 = vmax.f32 %v1153_v32, 0.0 }
 0x1f8   : > { %v1350_v39 = vmax.f32 %v1164_v34, 0.0 }
 0x1f9   : > { %v1348_v41 = vmax.f32 %v1156_v36, 0.0 }
 0x1fa   : > { %v1402_v42 = vpack.c.bf16 %v1350_v39, %v1349_v37 }
 0x1fb   : > { %v1401_v43 = vpack.c.bf16 %v1348_v41, %v1347_v40  ;;  %v2787_v44 = vpop.f32.mrb[56].mxu1 }
 0x1fc   : > { %v1177_v45 = vadd.f32 %v2787_v44, %v3426_v38  ;;  %v1168_v46 = vpop.f32.mrb[57].mxu1 }
 0x1fd   : > { %v1169_v47 = vadd.f32 %v3426_v38, %v1168_v46  ;;  %v2788_v49 = vpop.f32.mrb[58].mxu1  ;;  %2853 = vmatprep.mubr.msk.bf16.mxu0 %vm941_vm1, %v1401_v43 }
 0x1fe   : > { %v1180_v50 = vadd.f32 %v2788_v49, %v3426_v38  ;;  %v1171_v52 = vpop.f32.mrb[59].mxu1  ;;  %2854 = vmatmul.mubr.msk.bf16.gmra.mrb[52].mxu0 %vm941_vm1, %v1402_v42  ;;  %v1353_v55 = vmax.f32 %v1177_v45, 0.0 }
 0x1ff   : > { %v1172_v54 = vadd.f32 %v3426_v38, %v1171_v52  ;;  %v1351_v58 = vmax.f32 %v1169_v47, 0.0 }
 0x200   : > { %v1354_v57 = vmax.f32 %v1180_v50, 0.0 }
 0x201   : > { %v1352_v59 = vmax.f32 %v1172_v54, 0.0 }
 0x202   : > { %v1404_v60 = vpack.c.bf16 %v1354_v57, %v1353_v55 }
 0x203   : > { %v1403_v61 = vpack.c.bf16 %v1352_v59, %v1351_v58  ;;  %v2791_v62 = vpop.f32.mrb[60].mxu1 }
 0x204   : > { %v1193_v63 = vadd.f32 %v2791_v62, %v3426_v38  ;;  %v1184_v0 = vpop.f32.mrb[61].mxu1 }
 0x205   : > { %v1185_v1 = vadd.f32 %v3426_v38, %v1184_v0  ;;  %v2792_v2 = vpop.f32.mrb[62].mxu1  ;;  %2857 = vmatprep.mubr.msk.bf16.mxu0 %vm941_vm1, %v1403_v61 }
 0x206   : > { %v1196_v3 = vadd.f32 %v2792_v2, %v3426_v38  ;;  %v1187_v4 = vpop.f32.mrb[63].mxu1  ;;  %2858 = vmatmul.mubr.msk.bf16.gmra.mrb[56].mxu0 %vm941_vm1, %v1404_v60  ;;  %v1357_v6 = vmax.f32 %v1193_v63, 0.0 }
 0x207   : > { %v1188_v5 = vadd.f32 %v3426_v38, %v1187_v4  ;;  %v1355_v8 = vmax.f32 %v1185_v1, 0.0 }
 0x208   : > { %v1358_v7 = vmax.f32 %v1196_v3, 0.0 }
 0x209   : > { %v1356_v9 = vmax.f32 %v1188_v5, 0.0 }
 0x20a   : > { %v1406_v10 = vpack.c.bf16 %v1358_v7, %v1357_v6 }
 0x20b   : > { %v1405_v11 = vpack.c.bf16 %v1356_v9, %v1355_v8  ;;  %v2795_v12 = vpop.f32.mrb[64].mxu1 }
 0x20c   : > { %v1209_v13 = vadd.f32 %v2795_v12, %v3426_v38  ;;  %v1200_v15 = vpop.f32.mrb[65].mxu1 }
 0x20d   : > { %v1201_v16 = vadd.f32 %v3426_v38, %v1200_v15  ;;  %v2796_v19 = vpop.f32.mrb[66].mxu1  ;;  %2861 = vmatprep.mubr.msk.bf16.mxu0 %vm941_vm1, %v1405_v11 }
 0x20e   : > { %v1212_v21 = vadd.f32 %v2796_v19, %v3426_v38  ;;  %v1203_v22 = vpop.f32.mrb[67].mxu1  ;;  %2862 = vmatmul.mubr.msk.bf16.gmra.mrb[60].mxu0 %vm941_vm1, %v1406_v10  ;;  %v1361_v25 = vmax.f32 %v1209_v13, 0.0 }
 0x20f   : > { %v1204_v23 = vadd.f32 %v3426_v38, %v1203_v22  ;;  %v1359_v28 = vmax.f32 %v1201_v16, 0.0 }
 0x210   : > { %v1362_v26 = vmax.f32 %v1212_v21, 0.0 }
 0x211   : > { %v1360_v29 = vmax.f32 %v1204_v23, 0.0 }
 0x212   : > { %v1408_v30 = vpack.c.bf16 %v1362_v26, %v1361_v25 }
 0x213   : > { %v1407_v27 = vpack.c.bf16 %v1360_v29, %v1359_v28  ;;  %v2799_v24 = vpop.f32.mrb[68].mxu1 }
 0x214   : > { %v1225_v53 = vadd.f32 %v2799_v24, %v3426_v38  ;;  %v1216_v56 = vpop.f32.mrb[69].mxu1 }
 0x215   : > { %v1217_v17 = vadd.f32 %v3426_v38, %v1216_v56  ;;  %v2800_v20 = vpop.f32.mrb[70].mxu1  ;;  %2865 = vmatprep.mubr.msk.bf16.mxu0 %vm941_vm1, %v1407_v27 }
 0x216   : > { %v1228_v48 = vadd.f32 %v2800_v20, %v3426_v38  ;;  %v1219_v51 = vpop.f32.mrb[71].mxu1  ;;  %2866 = vmatmul.mubr.msk.bf16.gmra.mrb[64].mxu0 %vm941_vm1, %v1408_v30  ;;  %v1365_v18 = vmax.f32 %v1225_v53, 0.0 }
 0x217   : > { %v1220_v14 = vadd.f32 %v3426_v38, %v1219_v51  ;;  %v1363_v32 = vmax.f32 %v1217_v17, 0.0 }
 0x218   : > { %v1366_v31 = vmax.f32 %v1228_v48, 0.0 }
 0x219   : > { %v1364_v33 = vmax.f32 %v1220_v14, 0.0 }
 0x21a   : > { %v1410_v34 = vpack.c.bf16 %v1366_v31, %v1365_v18 }
 0x21b   : > { %v1409_v35 = vpack.c.bf16 %v1364_v33, %v1363_v32  ;;  %v2803_v36 = vpop.f32.mrb[72].mxu1 }
 0x21c   : > { %v1241_v37 = vadd.f32 %v2803_v36, %v3426_v38  ;;  %v1232_v39 = vpop.f32.mrb[73].mxu1 }
 0x21d   : > { %v1233_v40 = vadd.f32 %v3426_v38, %v1232_v39  ;;  %v2804_v41 = vpop.f32.mrb[74].mxu1  ;;  %2869 = vmatprep.mubr.msk.bf16.mxu0 %vm941_vm1, %v1409_v35 }
 0x21e   : > { %v1244_v42 = vadd.f32 %v2804_v41, %v3426_v38  ;;  %v1235_v43 = vpop.f32.mrb[75].mxu1  ;;  %2870 = vmatmul.mubr.msk.bf16.gmra.mrb[68].mxu0 %vm941_vm1, %v1410_v34  ;;  %v1369_v45 = vmax.f32 %v1241_v37, 0.0 }
 0x21f   : > { %v1236_v44 = vadd.f32 %v3426_v38, %v1235_v43  ;;  %v1367_v47 = vmax.f32 %v1233_v40, 0.0 }
 0x220   : > { %v1370_v46 = vmax.f32 %v1244_v42, 0.0 }
 0x221   : > { %v1368_v49 = vmax.f32 %v1236_v44, 0.0 }
 0x222   : > { %v1412_v50 = vpack.c.bf16 %v1370_v46, %v1369_v45 }
 0x223   : > { %v1411_v52 = vpack.c.bf16 %v1368_v49, %v1367_v47  ;;  %v2807_v54 = vpop.f32.mrb[76].mxu1 }
 0x224   : > { %v1257_v55 = vadd.f32 %v2807_v54, %v3426_v38  ;;  %v1248_v57 = vpop.f32.mrb[77].mxu1 }
 0x225   : > { %v1249_v58 = vadd.f32 %v3426_v38, %v1248_v57  ;;  %v2808_v59 = vpop.f32.mrb[78].mxu1  ;;  %2873 = vmatprep.mubr.msk.bf16.mxu0 %vm941_vm1, %v1411_v52 }
 0x226   : > { %v1260_v60 = vadd.f32 %v2808_v59, %v3426_v38  ;;  %v1251_v61 = vpop.f32.mrb[79].mxu1  ;;  %2874 = vmatmul.mubr.msk.bf16.gmra.mrb[72].mxu0 %vm941_vm1, %v1412_v50  ;;  %v1373_v63 = vmax.f32 %v1257_v55, 0.0 }
 0x227   : > { %v1252_v62 = vadd.f32 %v3426_v38, %v1251_v61  ;;  %v1371_v1 = vmax.f32 %v1249_v58, 0.0 }
 0x228   : > { %v1374_v0 = vmax.f32 %v1260_v60, 0.0 }
 0x229   : > { %v1372_v2 = vmax.f32 %v1252_v62, 0.0  ;;  %v3528_v62 = vld [vmem:[%s3936_s6] ss:$0 sm:$0xff] }
 0x22a   : > { %v1414_v3 = vpack.c.bf16 %v1374_v0, %v1373_v63 }
 0x22b   : > { %v1413_v4 = vpack.c.bf16 %v1372_v2, %v1371_v1  ;;  %v2811_v5 = vpop.f32.mrb[80].mxu1 }
 0x22c   : > { %v1273_v6 = vadd.f32 %v2811_v5, %v3426_v38  ;;  %v1264_v7 = vpop.f32.mrb[81].mxu1 }
 0x22d   : > { %v1265_v8 = vadd.f32 %v3426_v38, %v1264_v7  ;;  %v2812_v9 = vpop.f32.mrb[82].mxu1  ;;  %2877 = vmatprep.mubr.msk.bf16.mxu0 %vm941_vm1, %v1413_v4 }
 0x22e   : > { %v1276_v10 = vadd.f32 %v2812_v9, %v3426_v38  ;;  %v1267_v11 = vpop.f32.mrb[83].mxu1  ;;  %2878 = vmatmul.mubr.msk.bf16.gmra.mrb[76].mxu0 %vm941_vm1, %v1414_v3  ;;  %v1377_v13 = vmax.f32 %v1273_v6, 0.0 }
 0x22f   : > { %v1268_v12 = vadd.f32 %v3426_v38, %v1267_v11  ;;  %v1375_v16 = vmax.f32 %v1265_v8, 0.0 }
 0x230   : > { %v1378_v15 = vmax.f32 %v1276_v10, 0.0 }
 0x231   : > { %v1376_v19 = vmax.f32 %v1268_v12, 0.0 }
 0x232   : > { %v1416_v21 = vpack.c.bf16 %v1378_v15, %v1377_v13 }
 0x233   : > { %v1415_v22 = vpack.c.bf16 %v1376_v19, %v1375_v16  ;;  %v2815_v23 = vpop.f32.mrb[84].mxu1 }
 0x234   : > { %v1289_v25 = vadd.f32 %v2815_v23, %v3426_v38  ;;  %v1280_v26 = vpop.f32.mrb[85].mxu1 }
 0x235   : > { %v1281_v28 = vadd.f32 %v3426_v38, %v1280_v26  ;;  %v2816_v29 = vpop.f32.mrb[86].mxu1  ;;  %2881 = vmatprep.mubr.msk.bf16.mxu0 %vm941_vm1, %v1415_v22 }
 0x236   : > { %v1292_v30 = vadd.f32 %v2816_v29, %v3426_v38  ;;  %v1283_v27 = vpop.f32.mrb[87].mxu1  ;;  %2882 = vmatmul.mubr.msk.bf16.gmra.mrb[80].mxu0 %vm941_vm1, %v1416_v21  ;;  %v1381_v53 = vmax.f32 %v1289_v25, 0.0 }
 0x237   : > { %v1284_v24 = vadd.f32 %v3426_v38, %v1283_v27  ;;  %v1379_v17 = vmax.f32 %v1281_v28, 0.0 }
 0x238   : > { %v1382_v56 = vmax.f32 %v1292_v30, 0.0 }
 0x239   : > { %v1380_v20 = vmax.f32 %v1284_v24, 0.0 }
 0x23a   : > { %v1418_v48 = vpack.c.bf16 %v1382_v56, %v1381_v53 }
 0x23b   : > { %v1417_v51 = vpack.c.bf16 %v1380_v20, %v1379_v17  ;;  %v2819_v14 = vpop.f32.mrb[88].mxu1 }
 0x23c   : > { %v1305_v18 = vadd.f32 %v2819_v14, %v3426_v38  ;;  %v1296_v31 = vpop.f32.mrb[89].mxu1 }
 0x23d   : > { %v1297_v32 = vadd.f32 %v3426_v38, %v1296_v31  ;;  %v2820_v33 = vpop.f32.mrb[90].mxu1  ;;  %2885 = vmatprep.mubr.msk.bf16.mxu0 %vm941_vm1, %v1417_v51 }
 0x23e   : > { %v1308_v34 = vadd.f32 %v2820_v33, %v3426_v38  ;;  %v1299_v35 = vpop.f32.mrb[91].mxu1  ;;  %2886 = vmatmul.mubr.msk.bf16.gmra.mrb[84].mxu0 %vm941_vm1, %v1418_v48  ;;  %v1385_v37 = vmax.f32 %v1305_v18, 0.0 }
 0x23f   : > { %v1300_v36 = vadd.f32 %v3426_v38, %v1299_v35  ;;  %v1383_v40 = vmax.f32 %v1297_v32, 0.0 }
 0x240   : > { %v1386_v39 = vmax.f32 %v1308_v34, 0.0 }
 0x241   : > { %v1384_v41 = vmax.f32 %v1300_v36, 0.0 }
 0x242   : > { %v1420_v42 = vpack.c.bf16 %v1386_v39, %v1385_v37 }
 0x243   : > { %v1419_v43 = vpack.c.bf16 %v1384_v41, %v1383_v40  ;;  %v2823_v44 = vpop.f32.mrb[92].mxu1 }
 0x244   : > { %v1321_v45 = vadd.f32 %v2823_v44, %v3426_v38  ;;  %v1312_v46 = vpop.f32.mrb[93].mxu1 }
 0x245   : > { %v1313_v47 = vadd.f32 %v3426_v38, %v1312_v46  ;;  %v2824_v49 = vpop.f32.mrb[94].mxu1  ;;  %2889 = vmatprep.mubr.msk.bf16.mxu0 %vm941_vm1, %v1419_v43 }
 0x246   : > { %v1324_v50 = vadd.f32 %v2824_v49, %v3426_v38  ;;  %v1315_v52 = vpop.f32.mrb[95].mxu1  ;;  %2890 = vmatmul.mubr.msk.bf16.gmra.mrb[88].mxu0 %vm941_vm1, %v1420_v42  ;;  %v1389_v55 = vmax.f32 %v1321_v45, 0.0 }
 0x247   : > { %v1316_v54 = vadd.f32 %v3426_v38, %v1315_v52  ;;  %v1387_v58 = vmax.f32 %v1313_v47, 0.0 }
 0x248   : > { %v1390_v57 = vmax.f32 %v1324_v50, 0.0 }
 0x249   : > { %v1388_v59 = vmax.f32 %v1316_v54, 0.0 }
 0x24a   : > { %v1422_v60 = vpack.c.bf16 %v1390_v57, %v1389_v55 }
 0x24b   : > { %v1421_v61 = vpack.c.bf16 %v1388_v59, %v1387_v58 }
 0x24d   : > { %2893 = vmatprep.mubr.msk.bf16.mxu0 %vm941_vm1, %v1421_v61 }
 0x24e   : > { %2894 = vmatmul.mubr.msk.bf16.gmra.mrb[92].mxu0 %vm941_vm1, %v1422_v60 }
 0x2a9   : > { %v2835_v63 = vpop.f32.mrb[32].mxu0 }
 0x2aa   : > { %v1849_v38 = vadd.f32 %v2835_v63, %v3528_v62  ;;  %v1585_v0 = vpop.f32.mrb[33].mxu0 }
 0x2ab   : > { %v1847_v1 = vadd.f32 %v3528_v62, %v1585_v0  ;;  %v2836_v2 = vpop.f32.mrb[34].mxu0 }
 0x2ac   : > { %1914 = vst.msk [vmem:[%s3532_s11 + $0x10] sm:$0xff] %vm1911_vm2, %v1849_v38  ;;  %v1850_v3 = vadd.f32 %v2836_v2, %v3528_v62  ;;  %v1588_v4 = vpop.f32.mrb[35].mxu0 }
 0x2ad   : > { %1912 = vst.msk [vmem:[%s3532_s11] sm:$0xff] %vm1911_vm2, %v1847_v1  ;;  %v1848_v5 = vadd.f32 %v3528_v62, %v1588_v4 }
 0x2ae   : > { %1915 = vst.msk [vmem:[%s3532_s11 + $0x18] sm:$0xff] %vm1911_vm2, %v1850_v3 }
 0x2af   : > { %1913 = vst.msk [vmem:[%s3532_s11 + $0x8] sm:$0xff] %vm1911_vm2, %v1848_v5 }
 0x2b1   : > { %v2839_v6 = vpop.f32.mrb[36].mxu0 }
 0x2b2   : > { %v1853_v7 = vadd.f32 %v2839_v6, %v3528_v62  ;;  %v1601_v8 = vpop.f32.mrb[37].mxu0 }
 0x2b3   : > { %v1851_v9 = vadd.f32 %v3528_v62, %v1601_v8  ;;  %v2840_v10 = vpop.f32.mrb[38].mxu0 }
 0x2b4   : > { %1918 = vst.msk [vmem:[%s3532_s11 + $0x30] sm:$0xff] %vm1911_vm2, %v1853_v7  ;;  %v1854_v11 = vadd.f32 %v2840_v10, %v3528_v62  ;;  %v1604_v12 = vpop.f32.mrb[39].mxu0 }
 0x2b5   : > { %1916 = vst.msk [vmem:[%s3532_s11 + $0x20] sm:$0xff] %vm1911_vm2, %v1851_v9  ;;  %v1852_v13 = vadd.f32 %v3528_v62, %v1604_v12 }
 0x2b6   : > { %1919 = vst.msk [vmem:[%s3532_s11 + $0x38] sm:$0xff] %vm1911_vm2, %v1854_v11 }
 0x2b7   : > { %1917 = vst.msk [vmem:[%s3532_s11 + $0x28] sm:$0xff] %vm1911_vm2, %v1852_v13 }
 0x2b9   : > { %v2843_v15 = vpop.f32.mrb[40].mxu0 }
 0x2ba   : > { %v1857_v16 = vadd.f32 %v2843_v15, %v3528_v62  ;;  %v1617_v19 = vpop.f32.mrb[41].mxu0 }
 0x2bb   : > { %v1855_v21 = vadd.f32 %v3528_v62, %v1617_v19  ;;  %v2844_v22 = vpop.f32.mrb[42].mxu0 }
 0x2bc   : > { %1922 = vst.msk [vmem:[%s3532_s11 + $0x50] sm:$0xff] %vm1911_vm2, %v1857_v16  ;;  %v1858_v23 = vadd.f32 %v2844_v22, %v3528_v62  ;;  %v1620_v25 = vpop.f32.mrb[43].mxu0 }
 0x2bd   : > { %1920 = vst.msk [vmem:[%s3532_s11 + $0x40] sm:$0xff] %vm1911_vm2, %v1855_v21  ;;  %v1856_v26 = vadd.f32 %v3528_v62, %v1620_v25 }
 0x2be   : > { %1923 = vst.msk [vmem:[%s3532_s11 + $0x58] sm:$0xff] %vm1911_vm2, %v1858_v23 }
 0x2bf   : > { %1921 = vst.msk [vmem:[%s3532_s11 + $0x48] sm:$0xff] %vm1911_vm2, %v1856_v26 }
 0x2c1   : > { %v2847_v28 = vpop.f32.mrb[44].mxu0 }
 0x2c2   : > { %v1861_v29 = vadd.f32 %v2847_v28, %v3528_v62  ;;  %v1633_v30 = vpop.f32.mrb[45].mxu0 }
 0x2c3   : > { %v1859_v27 = vadd.f32 %v3528_v62, %v1633_v30  ;;  %v2848_v24 = vpop.f32.mrb[46].mxu0 }
 0x2c4   : > { %1926 = vst.msk [vmem:[%s3532_s11 + $0x70] sm:$0xff] %vm1911_vm2, %v1861_v29  ;;  %v1862_v53 = vadd.f32 %v2848_v24, %v3528_v62  ;;  %v1636_v56 = vpop.f32.mrb[47].mxu0 }
 0x2c5   : > { %1924 = vst.msk [vmem:[%s3532_s11 + $0x60] sm:$0xff] %vm1911_vm2, %v1859_v27  ;;  %v1860_v17 = vadd.f32 %v3528_v62, %v1636_v56 }
 0x2c6   : > { %1927 = vst.msk [vmem:[%s3532_s11 + $0x78] sm:$0xff] %vm1911_vm2, %v1862_v53 }
 0x2c7   : > { %1925 = vst.msk [vmem:[%s3532_s11 + $0x68] sm:$0xff] %vm1911_vm2, %v1860_v17 }
 0x2c9   : > { %v2851_v20 = vpop.f32.mrb[48].mxu0 }
 0x2ca   : > { %v1865_v48 = vadd.f32 %v2851_v20, %v3528_v62  ;;  %v1649_v51 = vpop.f32.mrb[49].mxu0 }
 0x2cb   : > { %v1863_v14 = vadd.f32 %v3528_v62, %v1649_v51  ;;  %v2852_v18 = vpop.f32.mrb[50].mxu0 }
 0x2cc   : > { %1930 = vst.msk [vmem:[%s3532_s11 + $0x90] sm:$0xff] %vm1911_vm2, %v1865_v48  ;;  %v1866_v31 = vadd.f32 %v2852_v18, %v3528_v62  ;;  %v1652_v32 = vpop.f32.mrb[51].mxu0 }
 0x2cd   : > { %1928 = vst.msk [vmem:[%s3532_s11 + $0x80] sm:$0xff] %vm1911_vm2, %v1863_v14  ;;  %v1864_v33 = vadd.f32 %v3528_v62, %v1652_v32 }
 0x2ce   : > { %1931 = vst.msk [vmem:[%s3532_s11 + $0x98] sm:$0xff] %vm1911_vm2, %v1866_v31 }
 0x2cf   : > { %1929 = vst.msk [vmem:[%s3532_s11 + $0x88] sm:$0xff] %vm1911_vm2, %v1864_v33 }
 0x2d1   : > { %v2855_v34 = vpop.f32.mrb[52].mxu0 }
 0x2d2   : > { %v1869_v35 = vadd.f32 %v2855_v34, %v3528_v62  ;;  %v1665_v36 = vpop.f32.mrb[53].mxu0 }
 0x2d3   : > { %v1867_v37 = vadd.f32 %v3528_v62, %v1665_v36  ;;  %v2856_v39 = vpop.f32.mrb[54].mxu0 }
 0x2d4   : > { %1934 = vst.msk [vmem:[%s3532_s11 + $0xb0] sm:$0xff] %vm1911_vm2, %v1869_v35  ;;  %v1870_v40 = vadd.f32 %v2856_v39, %v3528_v62  ;;  %v1668_v41 = vpop.f32.mrb[55].mxu0 }
 0x2d5   : > { %1932 = vst.msk [vmem:[%s3532_s11 + $0xa0] sm:$0xff] %vm1911_vm2, %v1867_v37  ;;  %v1868_v42 = vadd.f32 %v3528_v62, %v1668_v41 }
 0x2d6   : > { %1935 = vst.msk [vmem:[%s3532_s11 + $0xb8] sm:$0xff] %vm1911_vm2, %v1870_v40 }
 0x2d7   : > { %1933 = vst.msk [vmem:[%s3532_s11 + $0xa8] sm:$0xff] %vm1911_vm2, %v1868_v42 }
 0x2d9   : > { %v2859_v43 = vpop.f32.mrb[56].mxu0 }
 0x2da   : > { %v1873_v44 = vadd.f32 %v2859_v43, %v3528_v62  ;;  %v1681_v45 = vpop.f32.mrb[57].mxu0 }
 0x2db   : > { %v1871_v46 = vadd.f32 %v3528_v62, %v1681_v45  ;;  %v2860_v47 = vpop.f32.mrb[58].mxu0 }
 0x2dc   : > { %1938 = vst.msk [vmem:[%s3532_s11 + $0xd0] sm:$0xff] %vm1911_vm2, %v1873_v44  ;;  %v1874_v49 = vadd.f32 %v2860_v47, %v3528_v62  ;;  %v1684_v50 = vpop.f32.mrb[59].mxu0 }
 0x2dd   : > { %1936 = vst.msk [vmem:[%s3532_s11 + $0xc0] sm:$0xff] %vm1911_vm2, %v1871_v46  ;;  %v1872_v52 = vadd.f32 %v3528_v62, %v1684_v50 }
 0x2de   : > { %1939 = vst.msk [vmem:[%s3532_s11 + $0xd8] sm:$0xff] %vm1911_vm2, %v1874_v49 }
 0x2df   : > { %1937 = vst.msk [vmem:[%s3532_s11 + $0xc8] sm:$0xff] %vm1911_vm2, %v1872_v52 }
 0x2e1   : > { %v2863_v54 = vpop.f32.mrb[60].mxu0 }
 0x2e2   : > { %v1877_v55 = vadd.f32 %v2863_v54, %v3528_v62  ;;  %v1697_v57 = vpop.f32.mrb[61].mxu0 }
 0x2e3   : > { %v1875_v58 = vadd.f32 %v3528_v62, %v1697_v57  ;;  %v2864_v59 = vpop.f32.mrb[62].mxu0 }
 0x2e4   : > { %1942 = vst.msk [vmem:[%s3532_s11 + $0xf0] sm:$0xff] %vm1911_vm2, %v1877_v55  ;;  %v1878_v60 = vadd.f32 %v2864_v59, %v3528_v62  ;;  %v1700_v61 = vpop.f32.mrb[63].mxu0 }
 0x2e5   : > { %1940 = vst.msk [vmem:[%s3532_s11 + $0xe0] sm:$0xff] %vm1911_vm2, %v1875_v58  ;;  %v1876_v63 = vadd.f32 %v3528_v62, %v1700_v61 }
 0x2e6   : > { %1943 = vst.msk [vmem:[%s3532_s11 + $0xf8] sm:$0xff] %vm1911_vm2, %v1878_v60 }
 0x2e7   : > { %1941 = vst.msk [vmem:[%s3532_s11 + $0xe8] sm:$0xff] %vm1911_vm2, %v1876_v63 }
 0x2e9   : > { %v2867_v38 = vpop.f32.mrb[64].mxu0 }
 0x2ea   : > { %v1881_v0 = vadd.f32 %v2867_v38, %v3528_v62  ;;  %v1713_v1 = vpop.f32.mrb[65].mxu0 }
 0x2eb   : > { %v1879_v2 = vadd.f32 %v3528_v62, %v1713_v1  ;;  %v2868_v3 = vpop.f32.mrb[66].mxu0 }
 0x2ec   : > { %1946 = vst.msk [vmem:[%s3532_s11 + $0x110] sm:$0xff] %vm1911_vm2, %v1881_v0  ;;  %v1882_v4 = vadd.f32 %v2868_v3, %v3528_v62  ;;  %v1716_v5 = vpop.f32.mrb[67].mxu0 }
 0x2ed   : > { %1944 = vst.msk [vmem:[%s3532_s11 + $0x100] sm:$0xff] %vm1911_vm2, %v1879_v2  ;;  %v1880_v6 = vadd.f32 %v3528_v62, %v1716_v5 }
 0x2ee   : > { %1947 = vst.msk [vmem:[%s3532_s11 + $0x118] sm:$0xff] %vm1911_vm2, %v1882_v4 }
 0x2ef   : > { %1945 = vst.msk [vmem:[%s3532_s11 + $0x108] sm:$0xff] %vm1911_vm2, %v1880_v6 }
 0x2f1   : > { %v2871_v7 = vpop.f32.mrb[68].mxu0 }
 0x2f2   : > { %v1885_v8 = vadd.f32 %v2871_v7, %v3528_v62  ;;  %v1729_v9 = vpop.f32.mrb[69].mxu0 }
 0x2f3   : > { %v1883_v10 = vadd.f32 %v3528_v62, %v1729_v9  ;;  %v2872_v11 = vpop.f32.mrb[70].mxu0 }
 0x2f4   : > { %1950 = vst.msk [vmem:[%s3532_s11 + $0x130] sm:$0xff] %vm1911_vm2, %v1885_v8  ;;  %v1886_v12 = vadd.f32 %v2872_v11, %v3528_v62  ;;  %v1732_v13 = vpop.f32.mrb[71].mxu0 }
 0x2f5   : > { %1948 = vst.msk [vmem:[%s3532_s11 + $0x120] sm:$0xff] %vm1911_vm2, %v1883_v10  ;;  %v1884_v15 = vadd.f32 %v3528_v62, %v1732_v13 }
 0x2f6   : > { %1951 = vst.msk [vmem:[%s3532_s11 + $0x138] sm:$0xff] %vm1911_vm2, %v1886_v12 }
 0x2f7   : > { %1949 = vst.msk [vmem:[%s3532_s11 + $0x128] sm:$0xff] %vm1911_vm2, %v1884_v15 }
 0x2f9   : > { %v2875_v16 = vpop.f32.mrb[72].mxu0 }
 0x2fa   : > { %v1889_v19 = vadd.f32 %v2875_v16, %v3528_v62  ;;  %v1745_v21 = vpop.f32.mrb[73].mxu0 }
 0x2fb   : > { %v1887_v22 = vadd.f32 %v3528_v62, %v1745_v21  ;;  %v2876_v23 = vpop.f32.mrb[74].mxu0 }
 0x2fc   : > { %1954 = vst.msk [vmem:[%s3532_s11 + $0x150] sm:$0xff] %vm1911_vm2, %v1889_v19  ;;  %v1890_v25 = vadd.f32 %v2876_v23, %v3528_v62  ;;  %v1748_v26 = vpop.f32.mrb[75].mxu0 }
 0x2fd   : > { %1952 = vst.msk [vmem:[%s3532_s11 + $0x140] sm:$0xff] %vm1911_vm2, %v1887_v22  ;;  %v1888_v28 = vadd.f32 %v3528_v62, %v1748_v26 }
 0x2fe   : > { %1955 = vst.msk [vmem:[%s3532_s11 + $0x158] sm:$0xff] %vm1911_vm2, %v1890_v25 }
 0x2ff   : > { %1953 = vst.msk [vmem:[%s3532_s11 + $0x148] sm:$0xff] %vm1911_vm2, %v1888_v28 }
 0x301   : > { %v2879_v29 = vpop.f32.mrb[76].mxu0 }
 0x302   : > { %v1893_v30 = vadd.f32 %v2879_v29, %v3528_v62  ;;  %v1761_v27 = vpop.f32.mrb[77].mxu0 }
 0x303   : > { %v1891_v24 = vadd.f32 %v3528_v62, %v1761_v27  ;;  %v2880_v53 = vpop.f32.mrb[78].mxu0 }
 0x304   : > { %1958 = vst.msk [vmem:[%s3532_s11 + $0x170] sm:$0xff] %vm1911_vm2, %v1893_v30  ;;  %v1894_v56 = vadd.f32 %v2880_v53, %v3528_v62  ;;  %v1764_v17 = vpop.f32.mrb[79].mxu0 }
 0x305   : > { %1956 = vst.msk [vmem:[%s3532_s11 + $0x160] sm:$0xff] %vm1911_vm2, %v1891_v24  ;;  %v1892_v20 = vadd.f32 %v3528_v62, %v1764_v17 }
 0x306   : > { %1959 = vst.msk [vmem:[%s3532_s11 + $0x178] sm:$0xff] %vm1911_vm2, %v1894_v56 }
 0x307   : > { %1957 = vst.msk [vmem:[%s3532_s11 + $0x168] sm:$0xff] %vm1911_vm2, %v1892_v20 }
 0x309   : > { %v2883_v48 = vpop.f32.mrb[80].mxu0 }
 0x30a   : > { %v1897_v51 = vadd.f32 %v2883_v48, %v3528_v62  ;;  %v1777_v14 = vpop.f32.mrb[81].mxu0 }
 0x30b   : > { %v1895_v18 = vadd.f32 %v3528_v62, %v1777_v14  ;;  %v2884_v31 = vpop.f32.mrb[82].mxu0 }
 0x30c   : > { %1962 = vst.msk [vmem:[%s3532_s11 + $0x190] sm:$0xff] %vm1911_vm2, %v1897_v51  ;;  %v1898_v32 = vadd.f32 %v2884_v31, %v3528_v62  ;;  %v1780_v33 = vpop.f32.mrb[83].mxu0 }
 0x30d   : > { %1960 = vst.msk [vmem:[%s3532_s11 + $0x180] sm:$0xff] %vm1911_vm2, %v1895_v18  ;;  %v1896_v34 = vadd.f32 %v3528_v62, %v1780_v33 }
 0x30e   : > { %1963 = vst.msk [vmem:[%s3532_s11 + $0x198] sm:$0xff] %vm1911_vm2, %v1898_v32 }
 0x30f   : > { %1961 = vst.msk [vmem:[%s3532_s11 + $0x188] sm:$0xff] %vm1911_vm2, %v1896_v34 }
 0x311   : > { %v2887_v35 = vpop.f32.mrb[84].mxu0 }
 0x312   : > { %v1901_v36 = vadd.f32 %v2887_v35, %v3528_v62  ;;  %v1793_v37 = vpop.f32.mrb[85].mxu0 }
 0x313   : > { %v1899_v39 = vadd.f32 %v3528_v62, %v1793_v37  ;;  %v2888_v40 = vpop.f32.mrb[86].mxu0 }
 0x314   : > { %1966 = vst.msk [vmem:[%s3532_s11 + $0x1b0] sm:$0xff] %vm1911_vm2, %v1901_v36  ;;  %v1902_v41 = vadd.f32 %v2888_v40, %v3528_v62  ;;  %v1796_v42 = vpop.f32.mrb[87].mxu0 }
 0x315   : > { %1964 = vst.msk [vmem:[%s3532_s11 + $0x1a0] sm:$0xff] %vm1911_vm2, %v1899_v39  ;;  %v1900_v43 = vadd.f32 %v3528_v62, %v1796_v42 }
 0x316   : > { %1967 = vst.msk [vmem:[%s3532_s11 + $0x1b8] sm:$0xff] %vm1911_vm2, %v1902_v41 }
 0x317   : > { %1965 = vst.msk [vmem:[%s3532_s11 + $0x1a8] sm:$0xff] %vm1911_vm2, %v1900_v43 }
 0x319   : > { %v2891_v44 = vpop.f32.mrb[88].mxu0 }
 0x31a   : > { %v1905_v45 = vadd.f32 %v2891_v44, %v3528_v62  ;;  %v1809_v46 = vpop.f32.mrb[89].mxu0 }
 0x31b   : > { %v1903_v47 = vadd.f32 %v3528_v62, %v1809_v46  ;;  %v2892_v49 = vpop.f32.mrb[90].mxu0 }
 0x31c   : > { %1970 = vst.msk [vmem:[%s3532_s11 + $0x1d0] sm:$0xff] %vm1911_vm2, %v1905_v45  ;;  %v1906_v50 = vadd.f32 %v2892_v49, %v3528_v62  ;;  %v1812_v52 = vpop.f32.mrb[91].mxu0 }
 0x31d   : > { %1968 = vst.msk [vmem:[%s3532_s11 + $0x1c0] sm:$0xff] %vm1911_vm2, %v1903_v47  ;;  %v1904_v54 = vadd.f32 %v3528_v62, %v1812_v52 }
 0x31e   : > { %1971 = vst.msk [vmem:[%s3532_s11 + $0x1d8] sm:$0xff] %vm1911_vm2, %v1906_v50 }
 0x31f   : > { %1969 = vst.msk [vmem:[%s3532_s11 + $0x1c8] sm:$0xff] %vm1911_vm2, %v1904_v54 }
 0x321   : > { %v2895_v55 = vpop.f32.mrb[92].mxu0  ;;  %1982 = sbr.rel (!%p3152_p4) target bundleno = 880 (0x370), region = 52 }
 0x322   : > { %v1909_v57 = vadd.f32 %v2895_v55, %v3528_v62  ;;  %v1825_v58 = vpop.f32.mrb[93].mxu0 }
 0x323   : > { %v1907_v59 = vadd.f32 %v3528_v62, %v1825_v58  ;;  %v2896_v60 = vpop.f32.mrb[94].mxu0 }
 0x324   : > { %1974 = vst.msk [vmem:[%s3532_s11 + $0x1f0] sm:$0xff] %vm1911_vm2, %v1909_v57  ;;  %v1910_v61 = vadd.f32 %v2896_v60, %v3528_v62  ;;  %v1828_v63 = vpop.f32.mrb[95].mxu0 }
 0x325   : > { %1972 = vst.msk [vmem:[%s3532_s11 + $0x1e0] sm:$0xff] %vm1911_vm2, %v1907_v59  ;;  %v1908_v38 = vadd.f32 %v3528_v62, %v1828_v63 }
 0x326   : > { %1975 = vst.msk [vmem:[%s3532_s11 + $0x1f8] sm:$0xff] %vm1911_vm2, %v1910_v61 }
 0x327   : > { %1973 = vst.msk [vmem:[%s3532_s11 + $0x1e8] sm:$0xff] %vm1911_vm2, %v1908_v38 }
 0x328   : > { %s3948_s24 = smov (!%p1985_p8, %s1984_s24), 64 }
 0x329   : > { %s2561_s17 = sshll.u32 %s3948_s24, 7 }
 0x32a   : > { %p2564_p9 = scmp.eq.s32.totalorder %s2561_s17, 0 }
 0x32b   : > { %s3737_s18 = sshrl.u32 (!%p2564_p9), %s3948_s24, 6 }
 0x32c   : > { %1993 = sbr.rel (%p2564_p9) target bundleno = 880 (0x370), region = 56  ;;  %p2565_p10 = scmp.le.s32.totalorder (!%p2564_p9), %s3737_s18, 0 }
 0x333   : > { %2399 = sbr.rel (%p2565_p10) target bundleno = 859 (0x35b), region = 132  ;;  %s3939_s27 = smov (!%p2565_p10), %s3731_s16 }
 0x334   : > { %s3940_s9 = smov (!%p2565_p10), %s3532_s11  ;;  %s3746_s12 = smov (!%p2565_p10), 0  }
 0x335   : > { %s3748_s19 = smov (!%p2565_p10), 0  }
 0x33a LB: >> { %v2181_v62 = vld [vmem:[%s3061_s9] sm:$0xff]  ;;  %v2183_v0 = vld [vmem:[%s3061_s9 + $0x8] sm:$0xff]  ;;  %v2185_v1 = vld [vmem:[%s3061_s9 + $0x10] sm:$0xff]  ;;  %s2309_s20 = sadd.s32 1, %s3065_s12  ;;  %s2175_s19 = sadd.s32 1, %s3069_s19   ;;  %s3069_s19 = sphi %s3748_s19, %s2175_s19   ;;  %s3065_s12 = sphi %s3746_s12, %s3943_s12   ;;  %s3061_s9 = sphi %s3940_s9, %s3942_s9   ;;  %s3057_s27 = sphi %s3939_s27, %s3941_s27  }
 0x33b   : >> { %2182 = vst [vmem:[%s3057_s27] sm:$0xff] %v2181_v62  ;;  %2184 = vst [vmem:[%s3057_s27 + $0x8] sm:$0xff] %v2183_v0  ;;  %v2187_v2 = vld [vmem:[%s3061_s9 + $0x18] sm:$0xff]  ;;  %v2189_v3 = vld [vmem:[%s3061_s9 + $0x20] sm:$0xff]  ;;  %p2310_p11 = scmp.ge.s32.totalorder %s2309_s20, %s3737_s18  ;;  %p2174_p12 = scmp.ge.s32.totalorder %s2175_s19, %s3737_s18 }
 0x33c   : >> { %2186 = vst [vmem:[%s3057_s27 + $0x10] sm:$0xff] %v2185_v1  ;;  %v2191_v4 = vld [vmem:[%s3061_s9 + $0x28] sm:$0xff]  ;;  %2188 = vst [vmem:[%s3057_s27 + $0x18] sm:$0xff] %v2187_v2  ;;  %v2193_v5 = vld [vmem:[%s3061_s9 + $0x30] sm:$0xff] }
 0x33d   : >> { %2190 = vst [vmem:[%s3057_s27 + $0x20] sm:$0xff] %v2189_v3  ;;  %2192 = vst [vmem:[%s3057_s27 + $0x28] sm:$0xff] %v2191_v4  ;;  %v2195_v6 = vld [vmem:[%s3061_s9 + $0x38] sm:$0xff]  ;;  %v2197_v7 = vld [vmem:[%s3061_s9 + $0x40] sm:$0xff]  ;;  %s3950_s20 = smov (%p2310_p11, %s2309_s20), 0 }
 0x33e   : >> { %2194 = vst [vmem:[%s3057_s27 + $0x30] sm:$0xff] %v2193_v5  ;;  %2196 = vst [vmem:[%s3057_s27 + $0x38] sm:$0xff] %v2195_v6  ;;  %v2199_v8 = vld [vmem:[%s3061_s9 + $0x48] sm:$0xff]  ;;  %v2201_v9 = vld [vmem:[%s3061_s9 + $0x50] sm:$0xff]  ;;  %s2566_s21 = sshll.u32 %s3950_s20, 9  ;;  %s3943_s12 = smov %s3950_s20 }
 0x33f   : >> { %2198 = vst [vmem:[%s3057_s27 + $0x40] sm:$0xff] %v2197_v7  ;;  %v2203_v10 = vld [vmem:[%s3061_s9 + $0x58] sm:$0xff]  ;;  %2200 = vst [vmem:[%s3057_s27 + $0x48] sm:$0xff] %v2199_v8  ;;  %v2205_v11 = vld [vmem:[%s3061_s9 + $0x60] sm:$0xff]  ;;  %s3804_s22 = scalar_lea.vmem %s3532_s11, %s2566_s21 [#allocation2]   ;;  %s3807_s23 = scalar_lea.vmem %s3731_s16, %s2566_s21  }
 0x340   : >> { %2202 = vst [vmem:[%s3057_s27 + $0x50] sm:$0xff] %v2201_v9  ;;  %2204 = vst [vmem:[%s3057_s27 + $0x58] sm:$0xff] %v2203_v10  ;;  %v2207_v12 = vld [vmem:[%s3061_s9 + $0x68] sm:$0xff]  ;;  %v2209_v13 = vld [vmem:[%s3061_s9 + $0x70] sm:$0xff] }
 0x341   : >> { %2206 = vst [vmem:[%s3057_s27 + $0x60] sm:$0xff] %v2205_v11  ;;  %2208 = vst [vmem:[%s3057_s27 + $0x68] sm:$0xff] %v2207_v12  ;;  %v2211_v15 = vld [vmem:[%s3061_s9 + $0x78] sm:$0xff]  ;;  %v2213_v16 = vld [vmem:[%s3061_s9 + $0x80] sm:$0xff] }
 0x342   : >> { %2210 = vst [vmem:[%s3057_s27 + $0x70] sm:$0xff] %v2209_v13  ;;  %v2215_v19 = vld [vmem:[%s3061_s9 + $0x88] sm:$0xff]  ;;  %2212 = vst [vmem:[%s3057_s27 + $0x78] sm:$0xff] %v2211_v15  ;;  %v2217_v21 = vld [vmem:[%s3061_s9 + $0x90] sm:$0xff] }
 0x343   : >> { %2214 = vst [vmem:[%s3057_s27 + $0x80] sm:$0xff] %v2213_v16  ;;  %2216 = vst [vmem:[%s3057_s27 + $0x88] sm:$0xff] %v2215_v19  ;;  %v2219_v22 = vld [vmem:[%s3061_s9 + $0x98] sm:$0xff]  ;;  %v2221_v23 = vld [vmem:[%s3061_s9 + $0xa0] sm:$0xff] }
 0x344   : >> { %2218 = vst [vmem:[%s3057_s27 + $0x90] sm:$0xff] %v2217_v21  ;;  %2220 = vst [vmem:[%s3057_s27 + $0x98] sm:$0xff] %v2219_v22  ;;  %v2223_v25 = vld [vmem:[%s3061_s9 + $0xa8] sm:$0xff]  ;;  %v2225_v26 = vld [vmem:[%s3061_s9 + $0xb0] sm:$0xff] }
 0x345   : >> { %2222 = vst [vmem:[%s3057_s27 + $0xa0] sm:$0xff] %v2221_v23  ;;  %v2227_v28 = vld [vmem:[%s3061_s9 + $0xb8] sm:$0xff]  ;;  %2224 = vst [vmem:[%s3057_s27 + $0xa8] sm:$0xff] %v2223_v25  ;;  %v2229_v29 = vld [vmem:[%s3061_s9 + $0xc0] sm:$0xff] }
 0x346   : >> { %2226 = vst [vmem:[%s3057_s27 + $0xb0] sm:$0xff] %v2225_v26  ;;  %2228 = vst [vmem:[%s3057_s27 + $0xb8] sm:$0xff] %v2227_v28  ;;  %v2231_v30 = vld [vmem:[%s3061_s9 + $0xc8] sm:$0xff]  ;;  %v2233_v27 = vld [vmem:[%s3061_s9 + $0xd0] sm:$0xff] }
 0x347   : >> { %2230 = vst [vmem:[%s3057_s27 + $0xc0] sm:$0xff] %v2229_v29  ;;  %2232 = vst [vmem:[%s3057_s27 + $0xc8] sm:$0xff] %v2231_v30  ;;  %v2235_v24 = vld [vmem:[%s3061_s9 + $0xd8] sm:$0xff]  ;;  %v2237_v53 = vld [vmem:[%s3061_s9 + $0xe0] sm:$0xff] }
 0x348   : >> { %2234 = vst [vmem:[%s3057_s27 + $0xd0] sm:$0xff] %v2233_v27  ;;  %v2239_v56 = vld [vmem:[%s3061_s9 + $0xe8] sm:$0xff]  ;;  %2236 = vst [vmem:[%s3057_s27 + $0xd8] sm:$0xff] %v2235_v24  ;;  %v2241_v17 = vld [vmem:[%s3061_s9 + $0xf0] sm:$0xff] }
 0x349   : >> { %2238 = vst [vmem:[%s3057_s27 + $0xe0] sm:$0xff] %v2237_v53  ;;  %2240 = vst [vmem:[%s3057_s27 + $0xe8] sm:$0xff] %v2239_v56  ;;  %v2243_v20 = vld [vmem:[%s3061_s9 + $0xf8] sm:$0xff]  ;;  %v2245_v48 = vld [vmem:[%s3061_s9 + $0x100] sm:$0xff] }
 0x34a   : >> { %2242 = vst [vmem:[%s3057_s27 + $0xf0] sm:$0xff] %v2241_v17  ;;  %2244 = vst [vmem:[%s3057_s27 + $0xf8] sm:$0xff] %v2243_v20  ;;  %v2247_v51 = vld [vmem:[%s3061_s9 + $0x108] sm:$0xff]  ;;  %v2249_v14 = vld [vmem:[%s3061_s9 + $0x110] sm:$0xff] }
 0x34b   : >> { %2246 = vst [vmem:[%s3057_s27 + $0x100] sm:$0xff] %v2245_v48  ;;  %v2251_v18 = vld [vmem:[%s3061_s9 + $0x118] sm:$0xff]  ;;  %2248 = vst [vmem:[%s3057_s27 + $0x108] sm:$0xff] %v2247_v51  ;;  %v2253_v31 = vld [vmem:[%s3061_s9 + $0x120] sm:$0xff] }
 0x34c   : >> { %2250 = vst [vmem:[%s3057_s27 + $0x110] sm:$0xff] %v2249_v14  ;;  %2252 = vst [vmem:[%s3057_s27 + $0x118] sm:$0xff] %v2251_v18  ;;  %v2255_v32 = vld [vmem:[%s3061_s9 + $0x128] sm:$0xff]  ;;  %v2257_v33 = vld [vmem:[%s3061_s9 + $0x130] sm:$0xff] }
 0x34d   : >> { %2254 = vst [vmem:[%s3057_s27 + $0x120] sm:$0xff] %v2253_v31  ;;  %2256 = vst [vmem:[%s3057_s27 + $0x128] sm:$0xff] %v2255_v32  ;;  %v2259_v34 = vld [vmem:[%s3061_s9 + $0x138] sm:$0xff]  ;;  %v2261_v35 = vld [vmem:[%s3061_s9 + $0x140] sm:$0xff] }
 0x34e   : >> { %2258 = vst [vmem:[%s3057_s27 + $0x130] sm:$0xff] %v2257_v33  ;;  %v2263_v36 = vld [vmem:[%s3061_s9 + $0x148] sm:$0xff]  ;;  %2260 = vst [vmem:[%s3057_s27 + $0x138] sm:$0xff] %v2259_v34  ;;  %v2265_v37 = vld [vmem:[%s3061_s9 + $0x150] sm:$0xff] }
 0x34f   : >> { %2262 = vst [vmem:[%s3057_s27 + $0x140] sm:$0xff] %v2261_v35  ;;  %2264 = vst [vmem:[%s3057_s27 + $0x148] sm:$0xff] %v2263_v36  ;;  %v2267_v39 = vld [vmem:[%s3061_s9 + $0x158] sm:$0xff]  ;;  %v2269_v40 = vld [vmem:[%s3061_s9 + $0x160] sm:$0xff] }
 0x350   : >> { %2266 = vst [vmem:[%s3057_s27 + $0x150] sm:$0xff] %v2265_v37  ;;  %2268 = vst [vmem:[%s3057_s27 + $0x158] sm:$0xff] %v2267_v39  ;;  %v2271_v41 = vld [vmem:[%s3061_s9 + $0x168] sm:$0xff]  ;;  %v2273_v42 = vld [vmem:[%s3061_s9 + $0x170] sm:$0xff] }
 0x351   : >> { %2270 = vst [vmem:[%s3057_s27 + $0x160] sm:$0xff] %v2269_v40  ;;  %v2275_v43 = vld [vmem:[%s3061_s9 + $0x178] sm:$0xff]  ;;  %2272 = vst [vmem:[%s3057_s27 + $0x168] sm:$0xff] %v2271_v41  ;;  %v2277_v44 = vld [vmem:[%s3061_s9 + $0x180] sm:$0xff] }
 0x352   : >> { %2274 = vst [vmem:[%s3057_s27 + $0x170] sm:$0xff] %v2273_v42  ;;  %2276 = vst [vmem:[%s3057_s27 + $0x178] sm:$0xff] %v2275_v43  ;;  %v2279_v45 = vld [vmem:[%s3061_s9 + $0x188] sm:$0xff]  ;;  %v2281_v46 = vld [vmem:[%s3061_s9 + $0x190] sm:$0xff] }
 0x353   : >> { %2278 = vst [vmem:[%s3057_s27 + $0x180] sm:$0xff] %v2277_v44  ;;  %2280 = vst [vmem:[%s3057_s27 + $0x188] sm:$0xff] %v2279_v45  ;;  %v2283_v47 = vld [vmem:[%s3061_s9 + $0x198] sm:$0xff]  ;;  %v2285_v49 = vld [vmem:[%s3061_s9 + $0x1a0] sm:$0xff] }
 0x354   : >> { %2282 = vst [vmem:[%s3057_s27 + $0x190] sm:$0xff] %v2281_v46  ;;  %v2287_v50 = vld [vmem:[%s3061_s9 + $0x1a8] sm:$0xff]  ;;  %2284 = vst [vmem:[%s3057_s27 + $0x198] sm:$0xff] %v2283_v47  ;;  %v2289_v52 = vld [vmem:[%s3061_s9 + $0x1b0] sm:$0xff]  ;;  %2177 = sbr.rel (!%p2174_p12) target bundleno = 826 (0x33a), region = 138 }
 0x355   : >> { %2286 = vst [vmem:[%s3057_s27 + $0x1a0] sm:$0xff] %v2285_v49  ;;  %2288 = vst [vmem:[%s3057_s27 + $0x1a8] sm:$0xff] %v2287_v50  ;;  %v2291_v54 = vld [vmem:[%s3061_s9 + $0x1b8] sm:$0xff]  ;;  %v2293_v55 = vld [vmem:[%s3061_s9 + $0x1c0] sm:$0xff] }
 0x356   : >> { %2290 = vst [vmem:[%s3057_s27 + $0x1b0] sm:$0xff] %v2289_v52  ;;  %2292 = vst [vmem:[%s3057_s27 + $0x1b8] sm:$0xff] %v2291_v54  ;;  %v2295_v57 = vld [vmem:[%s3061_s9 + $0x1c8] sm:$0xff]  ;;  %v2297_v58 = vld [vmem:[%s3061_s9 + $0x1d0] sm:$0xff] }
 0x357   : >> { %2294 = vst [vmem:[%s3057_s27 + $0x1c0] sm:$0xff] %v2293_v55  ;;  %v2299_v59 = vld [vmem:[%s3061_s9 + $0x1d8] sm:$0xff]  ;;  %2296 = vst [vmem:[%s3057_s27 + $0x1c8] sm:$0xff] %v2295_v57  ;;  %v2301_v60 = vld [vmem:[%s3061_s9 + $0x1e0] sm:$0xff] }
 0x358   : >> { %2298 = vst [vmem:[%s3057_s27 + $0x1d0] sm:$0xff] %v2297_v58  ;;  %2300 = vst [vmem:[%s3057_s27 + $0x1d8] sm:$0xff] %v2299_v59  ;;  %v2303_v61 = vld [vmem:[%s3061_s9 + $0x1e8] sm:$0xff]  ;;  %v2305_v63 = vld [vmem:[%s3061_s9 + $0x1f0] sm:$0xff] }
 0x359   : >> { %2302 = vst [vmem:[%s3057_s27 + $0x1e0] sm:$0xff] %v2301_v60  ;;  %2304 = vst [vmem:[%s3057_s27 + $0x1e8] sm:$0xff] %v2303_v61  ;;  %v2307_v38 = vld [vmem:[%s3061_s9 + $0x1f8] sm:$0xff]  ;;  %s3942_s9 = smov %s3804_s22 }
 0x35a   : >> { %2306 = vst [vmem:[%s3057_s27 + $0x1f0] sm:$0xff] %v2305_v63  ;;  %2308 = vst [vmem:[%s3057_s27 + $0x1f8] sm:$0xff] %v2307_v38  ;;  %s3941_s27 = smov %s3807_s23 }
 0x35b PF: > { %s3912_s26 = sand.u32 63, %s3948_s24   ;;  %s2577_s29 = sshll.u32 %s3737_s18, 9 }
 0x35c   : > { %s2320_s30 = scalar_lea.vmem %s3532_s11, %s2577_s29 [#allocation2]   ;;  %s2322_s10 = scalar_lea.vmem %s3731_s16, %s2577_s29  }
 0x35d   : > { %p2571_p13 = scmp.le.s32.totalorder %s3912_s26, 0 }
 0x35e   : > { %s3071_s13 = smov (!%p2571_p13), %s2322_s10   ;;  %s3075_s14 = smov (!%p2571_p13), %s2320_s30  }
 0x35f   : > { %2413 = sbr.rel (%p2571_p13) target bundleno = 880 (0x370), region = 143  ;;  %s3079_s15 = smov (!%p2571_p13), 0  }
 0x360   : > { %s3083_s17 = smov (!%p2571_p13), 0  }
 0x366 LB: >> { %v2332_v62 = vld [vmem:[%s3077_s14] sm:$0xff]  ;;  %s2334_s24 = sadd.s32 1, %s3081_s15  ;;  %s2326_s17 = sadd.s32 1, %s3085_s17   ;;  %s3085_s17 = sphi %s3083_s17, %s2326_s17   ;;  %s3081_s15 = sphi %s3079_s15, %s3080_s15   ;;  %s3077_s14 = sphi %s3075_s14, %s2339_s14   ;;  %s3073_s13 = sphi %s3071_s13, %s2340_s13  }
 0x367   : >> { %2333 = vst [vmem:[%s3073_s13] sm:$0xff] %v2332_v62  ;;  %p2335_p0 = scmp.ge.s32.totalorder %s2334_s24, %s3912_s26  ;;  %p2325_p1 = scmp.ge.s32.totalorder %s2326_s17, %s3912_s26 }
 0x369   : >> { %s3952_s24 = smov (%p2335_p0, %s2334_s24), 0  ;;  %2328 = sbr.rel (!%p2325_p1) target bundleno = 870 (0x366), region = 149 }
 0x36a   : >> { %s2572_s11 = sshll.u32 %s3952_s24, 3  ;;  %s3080_s15 = smov %s3952_s24  }
 0x36b   : >> { %s2339_s14 = scalar_lea.vmem %s2320_s30, %s2572_s11 [#allocation2]   ;;  %s2340_s13 = scalar_lea.vmem %s2322_s10, %s2572_s11  }
 0x370 PF: > { %p14_p2 = scmp.ge.s32.totalorder %s3142_s28, 6   ;;  %s3944_s24 = smov %s3049_s25 }
 0x371   : > { %s3945_s25 = smov %s3150_s8  ;;  %s3946_s26 = smov %s3142_s28 }
 0x372   :  { %16 = sbr.rel (!%p14_p2) target bundleno = 2 (0x2), region = 160 }

</bundles_post_ra>
